<compile_context>
chip_gen: v7x
topology: tpu7x:2x2x1
jax: 0.10.0
libtpu: 0.0.40
codegen_flags: <defaults>
</compile_context>

<pallas_src>
import functools

import jax
import jax.numpy as jnp
from jax import lax
from jax.experimental import pallas as pl
from jax.experimental.pallas import tpu as pltpu


def _layernorm(x, scale, shift, eps=1e-5):
    # Two-pass mean/variance (matches the reference numerically); rsqrt -> EUP.
    mean = jnp.mean(x, axis=-1, keepdims=True)
    xc = x - mean
    var = jnp.mean(xc * xc, axis=-1, keepdims=True)
    return scale * (xc * lax.rsqrt(var + eps)) + shift


def _gelu_tanh(x):
    c = jnp.sqrt(jnp.float32(2.0 / jnp.pi))
    return 0.5 * x * (1.0 + jnp.tanh(c * (x + 0.044715 * (x * x * x))))


def transformer_block_kernel(
    # inputs
    x_full_ref, x_q_ref,
    ln1_s_ref, ln1_b_ref,
    wq_ref, bq_ref, wk_ref, bk_ref, wv_ref, bv_ref,
    wo_ref, bo_ref,
    ln2_s_ref, ln2_b_ref,
    w1_ref, b1_ref, w2_ref, b2_ref,
    # output
    o_ref,
    # scratch (persist across grid steps)
    xn_sc, q_sc, k_sc, v_sc, m_sc, l_sc, acc_sc,
    *, num_heads, q_tile,
):
    qi = pl.program_id(1)
    TQ = q_tile
    T = x_full_ref.shape[1]
    D = x_full_ref.shape[2]
    hd = D // num_heads
    q_start = pl.multiple_of(qi * TQ, TQ)

    ln1_s = ln1_s_ref[...]
    ln1_b = ln1_b_ref[...]

    # ---- per-batch-element cache fill: LN1(x) and full-width K/V projections ----
    @pl.when(qi == 0)
    def _():
        x_full = x_full_ref[0]                                    # (T, D) f32
        xn_b = _layernorm(x_full, ln1_s, ln1_b).astype(jnp.bfloat16)
        xn_sc[...] = xn_b
        k_full = (jnp.dot(xn_b, wk_ref[...], preferred_element_type=jnp.float32)
                  + bk_ref[...]).astype(jnp.bfloat16)             # (T, D)
        v_full = (jnp.dot(xn_b, wv_ref[...], preferred_element_type=jnp.float32)
                  + bv_ref[...]).astype(jnp.bfloat16)             # (T, D)
        for h in range(num_heads):                                # split heads once
            k_sc[h] = k_full[:, h * hd:(h + 1) * hd]
            v_sc[h] = v_full[:, h * hd:(h + 1) * hd]

    # ---- queries for this tile (LN1 reused from the cache) ----
    xn_q_b = xn_sc[pl.ds(q_start, TQ), :]                         # (TQ, D) bf16
    q_all = (jnp.dot(xn_q_b, wq_ref[...], preferred_element_type=jnp.float32)
             + bq_ref[...]).astype(jnp.bfloat16)                  # (TQ, D)
    for h in range(num_heads):
        q_sc[h] = q_all[:, h * hd:(h + 1) * hd]

    inv_sqrt_hd = jnp.float32(1.0 / (hd ** 0.5))

    # ---- flash-style causal attention over only the needed KV tiles ----
    m_sc[...] = jnp.full(m_sc.shape, -jnp.inf, jnp.float32)
    l_sc[...] = jnp.zeros(l_sc.shape, jnp.float32)
    acc_sc[...] = jnp.zeros(acc_sc.shape, jnp.float32)

    rows = lax.broadcasted_iota(jnp.int32, (TQ, TQ), 0) + q_start
    cols_local = lax.broadcasted_iota(jnp.int32, (TQ, TQ), 1)

    @pl.loop(0, qi + 1)                       # dynamic trip count: skip masked tiles
    def _(kv_i):
        kv_start = pl.multiple_of(kv_i * TQ, TQ)
        causal = rows >= (cols_local + kv_start)
        for h in range(num_heads):
            q_h = q_sc[h]                                        # (TQ, hd) bf16
            k_h = k_sc[h, pl.ds(kv_start, TQ), :]                # (TQ, hd) bf16
            v_h = v_sc[h, pl.ds(kv_start, TQ), :]                # (TQ, hd) bf16
            # Contract the head dim of q and k directly (no materialized k.T).
            s = lax.dot_general(
                q_h, k_h,
                dimension_numbers=(((1,), (1,)), ((), ())),
                preferred_element_type=jnp.float32) * inv_sqrt_hd  # (TQ, TQ) f32
            s = jnp.where(causal, s, jnp.float32(-1e9))
            m_prev = m_sc[h]                                      # (TQ, 1)
            m_new = jnp.maximum(m_prev, jnp.max(s, axis=-1, keepdims=True))
            alpha = jnp.exp(m_prev - m_new)
            p = jnp.exp(s - m_new)
            l_sc[h] = alpha * l_sc[h] + jnp.sum(p, axis=-1, keepdims=True)
            acc_sc[h] = alpha * acc_sc[h] + jnp.dot(
                p.astype(jnp.bfloat16), v_h, preferred_element_type=jnp.float32)
            m_sc[h] = m_new
        # TODO(synk): attention-weight dropout omitted (inference / eval mode).

    # ---- finalize softmax, concat heads, single full-width output projection ----
    ctx = jnp.concatenate(
        [acc_sc[h] * pl.reciprocal(l_sc[h], approx=True) for h in range(num_heads)],
        axis=-1).astype(jnp.bfloat16)                             # (TQ, D)
    attn_out = (jnp.dot(ctx, wo_ref[...], preferred_element_type=jnp.float32)
                + bo_ref[...])

    # drop_skip is identity in eval mode.
    x1 = x_q_ref[0] + attn_out                                    # (TQ, D) f32

    # ---- LayerNorm 2 + FeedForward (GELU tanh approximation) ----
    xn2 = _layernorm(x1, ln2_s_ref[...], ln2_b_ref[...])
    h1 = jnp.dot(xn2.astype(jnp.bfloat16), w1_ref[...],
                 preferred_element_type=jnp.float32) + b1_ref[...]
    h1 = _gelu_tanh(h1)
    ff = jnp.dot(h1.astype(jnp.bfloat16), w2_ref[...],
                 preferred_element_type=jnp.float32) + b2_ref[...]

    o_ref[0] = (x1 + ff).astype(o_ref.dtype)


def _vmem_capacity_bytes():
    try:
        return int(getattr(pltpu.get_tpu_info(), "vmem_capacity_bytes", 128 << 20))
    except Exception:
        return 64 << 20  # conservative fallback valid on every generation


def _choose_q_tile(T, cap_bytes):
    # Bigger tiles on 128 MiB VMEM parts (v5e/v6e); 256 on 64 MiB parts (v7x).
    max_tile = 512 if cap_bytes >= (100 << 20) else 256
    if T <= max_tile:
        return T
    for tq in (512, 256, 128, 64, 32, 16, 8):
        if tq <= max_tile and T % tq == 0:
            return tq
    return T


def _vmem_limit_bytes(weight_args, T, D, TQ, num_heads, cap_bytes):
    f32 = 4
    hd = D // num_heads
    hd_pad = ((hd + 127) // 128) * 128
    weight_bytes = sum(int(w.size) * w.dtype.itemsize for w in weight_args)
    scratch = (T * D * 2                                # xn cache (bf16)
               + 2 * num_heads * T * hd_pad * 2         # K/V caches (bf16, lane-padded)
               + num_heads * TQ * hd_pad * 2            # q scratch (bf16)
               + num_heads * TQ * 2 * 128 * f32         # m, l (lane-padded)
               + num_heads * TQ * hd_pad * f32)         # acc
    io = 2 * (T * D * f32) + 4 * (TQ * D * f32)         # x_full + x_q/out (dbl-buffered)
    act = f32 * (2 * T * D + TQ * TQ + TQ * 4 * D + 8 * TQ * D)
    need = 2 * weight_bytes + io + scratch + 2 * act + (8 << 20)
    return int(min(max(need, 32 << 20), (cap_bytes * 3) // 4))


def transformer_block(x, params, num_heads):
    """x: (B, T, D) float32.  params: dict of f32 weights (see init_params)."""
    B, T, D = x.shape
    assert D % num_heads == 0
    hd = D // num_heads

    cap = _vmem_capacity_bytes()
    TQ = _choose_q_tile(T, cap)
    assert T % TQ == 0
    NQ = T // TQ

    bf16 = jnp.bfloat16
    # Matmul weights in bf16 (MXU throughput, half the weight DMA bytes); LN
    # params and biases stay f32.  No per-head host splitting: projections are
    # full-width and heads are split once in-kernel into the K/V caches.
    wq = params["wq"].astype(bf16)
    wk = params["wk"].astype(bf16)
    wv = params["wv"].astype(bf16)
    wo = params["wo"].astype(bf16)
    w1 = params["w1"].astype(bf16)
    w2 = params["w2"].astype(bf16)

    weight_args = (
        params["ln1_scale"], params["ln1_shift"],
        wq, params["bq"], wk, params["bk"], wv, params["bv"],
        wo, params["bo"],
        params["ln2_scale"], params["ln2_shift"],
        w1, params["b1"], w2, params["b2"],
    )

    def const_spec(arr):
        nd = arr.ndim
        return pl.BlockSpec(arr.shape, lambda b, q, _n=nd: (0,) * _n)

    in_specs = [
        pl.BlockSpec((1, T, D), lambda b, q: (b, 0, 0)),   # full sequence (K/V path)
        pl.BlockSpec((1, TQ, D), lambda b, q: (b, q, 0)),  # query/residual tile
    ]
    in_specs += [const_spec(w) for w in weight_args]

    scratch_shapes = [
        pltpu.VMEM((T, D), bf16),                          # LN1(x) cache
        pltpu.VMEM((num_heads, TQ, hd), bf16),             # per-head Q (this tile)
        pltpu.VMEM((num_heads, T, hd), bf16),              # K cache
        pltpu.VMEM((num_heads, T, hd), bf16),              # V cache
        pltpu.VMEM((num_heads, TQ, 1), jnp.float32),       # flash running max
        pltpu.VMEM((num_heads, TQ, 1), jnp.float32),       # flash running denom
        pltpu.VMEM((num_heads, TQ, hd), jnp.float32),      # flash running context
    ]

    kernel = functools.partial(transformer_block_kernel,
                               num_heads=num_heads, q_tile=TQ)

    vmem_limit = _vmem_limit_bytes(weight_args, T, D, TQ, num_heads, cap)

    return pl.pallas_call(
        kernel,
        out_shape=jax.ShapeDtypeStruct((B, T, D), x.dtype),
        grid_spec=pltpu.PrefetchScalarGridSpec(
            num_scalar_prefetch=0,
            grid=(B, NQ),
            in_specs=in_specs,
            out_specs=pl.BlockSpec((1, TQ, D), lambda b, q: (b, q, 0)),
            scratch_shapes=scratch_shapes,
        ),
        compiler_params=pltpu.CompilerParams(
            # B parallel (megacore shards batch), q arbitrary (K/V cache reuse).
            dimension_semantics=("parallel", "arbitrary"),
            vmem_limit_bytes=vmem_limit,
        ),
    )(x, x, *weight_args)


def transformer_block_ref(x, params, num_heads):
    """Pure-JAX f32 reference (matches the PyTorch module)."""
    def ln(v, s, b, eps=1e-5):
        m = v.mean(-1, keepdims=True)
        var = ((v - m) ** 2).mean(-1, keepdims=True)
        return s * (v - m) / jnp.sqrt(var + eps) + b

    B, T, D = x.shape
    hd = D // num_heads
    shortcut = x
    xn = ln(x, params["ln1_scale"], params["ln1_shift"])
    q = xn @ params["wq"] + params["bq"]
    k = xn @ params["wk"] + params["bk"]
    v = xn @ params["wv"] + params["bv"]
    q = q.reshape(B, T, num_heads, hd).transpose(0, 2, 1, 3)
    k = k.reshape(B, T, num_heads, hd).transpose(0, 2, 1, 3)
    v = v.reshape(B, T, num_heads, hd).transpose(0, 2, 1, 3)
    s = jnp.einsum("bhqd,bhkd->bhqk", q, k) / jnp.sqrt(jnp.float32(hd))
    mask = jnp.tril(jnp.ones((T, T), bool))
    s = jnp.where(mask, s, -jnp.inf)
    p = jax.nn.softmax(s, axis=-1)
    ctx = jnp.einsum("bhqk,bhkd->bhqd", p, v).transpose(0, 2, 1, 3).reshape(B, T, D)
    attn = ctx @ params["wo"] + params["bo"]
    x1 = shortcut + attn
    xn2 = ln(x1, params["ln2_scale"], params["ln2_shift"])
    h1 = xn2 @ params["w1"] + params["b1"]
    g = 0.5 * h1 * (1 + jnp.tanh(jnp.sqrt(2.0 / jnp.pi) * (h1 + 0.044715 * h1 ** 3)))
    ff = g @ params["w2"] + params["b2"]
    return x1 + ff


def init_params(key, emb_dim):
    """Deterministic synthetic parameter init (shapes match the PyTorch module)."""
    D = emb_dim
    H = 4 * D
    keys = jax.random.split(key, 8)
    s = 0.02
    return {
        "ln1_scale": jnp.ones((1, D), jnp.float32),
        "ln1_shift": jnp.zeros((1, D), jnp.float32),
        "ln2_scale": jnp.ones((1, D), jnp.float32),
        "ln2_shift": jnp.zeros((1, D), jnp.float32),
        "wq": s * jax.random.normal(keys[0], (D, D), jnp.float32),
        "bq": jnp.zeros((1, D), jnp.float32),
        "wk": s * jax.random.normal(keys[1], (D, D), jnp.float32),
        "bk": jnp.zeros((1, D), jnp.float32),
        "wv": s * jax.random.normal(keys[2], (D, D), jnp.float32),
        "bv": jnp.zeros((1, D), jnp.float32),
        "wo": s * jax.random.normal(keys[3], (D, D), jnp.float32),
        "bo": jnp.zeros((1, D), jnp.float32),
        "w1": s * jax.random.normal(keys[4], (D, H), jnp.float32),
        "b1": jnp.zeros((1, H), jnp.float32),
        "w2": s * jax.random.normal(keys[5], (H, D), jnp.float32),
        "b2": jnp.zeros((1, D), jnp.float32),
    }


if __name__ == "__main__":
    # Small config consistent with the module:
    # emb_dim=32, context_length=8, n_heads=4, drop_rate (identity at eval),
    # qkv_bias=True.
    B, T, D, NH = 2, 8, 32, 4

    key = jax.random.PRNGKey(0)
    kx, kp = jax.random.split(key)
    x = jax.random.normal(kx, (B, T, D), jnp.float32)
    params = init_params(kp, D)

    out = transformer_block(x, params, num_heads=NH)
    out = jax.block_until_ready(out)

    assert out.shape == (B, T, D) and out.dtype == jnp.float32

    # Loose tolerance: kernel uses bf16 matmul operands + approx reciprocal.
    ref = transformer_block_ref(x, params, NH)
    assert jnp.allclose(out, ref, atol=5e-2, rtol=5e-2), float(jnp.max(jnp.abs(out - ref)))

    print("KERNEL_OK")
</pallas_src>

<mosaic_0001>
module attributes {stable_mosaic.version = 11 : i64} {
  func.func @transformer_block_kernel(%arg0: i32, %arg1: i32, %arg2: memref<1x8x32xf32, #tpu.memory_space<vmem>>, %arg3: memref<1x8x32xf32, #tpu.memory_space<vmem>>, %arg4: memref<1x32xf32, #tpu.memory_space<vmem>>, %arg5: memref<1x32xf32, #tpu.memory_space<vmem>>, %arg6: memref<32x32xbf16, #tpu.memory_space<vmem>>, %arg7: memref<1x32xf32, #tpu.memory_space<vmem>>, %arg8: memref<32x32xbf16, #tpu.memory_space<vmem>>, %arg9: memref<1x32xf32, #tpu.memory_space<vmem>>, %arg10: memref<32x32xbf16, #tpu.memory_space<vmem>>, %arg11: memref<1x32xf32, #tpu.memory_space<vmem>>, %arg12: memref<32x32xbf16, #tpu.memory_space<vmem>>, %arg13: memref<1x32xf32, #tpu.memory_space<vmem>>, %arg14: memref<1x32xf32, #tpu.memory_space<vmem>>, %arg15: memref<1x32xf32, #tpu.memory_space<vmem>>, %arg16: memref<32x128xbf16, #tpu.memory_space<vmem>>, %arg17: memref<1x128xf32, #tpu.memory_space<vmem>>, %arg18: memref<128x32xbf16, #tpu.memory_space<vmem>>, %arg19: memref<1x32xf32, #tpu.memory_space<vmem>>, %arg20: memref<1x8x32xf32, #tpu.memory_space<vmem>>, %arg21: memref<8x32xbf16, #tpu.memory_space<vmem>>, %arg22: memref<4x8x8xbf16, #tpu.memory_space<vmem>>, %arg23: memref<4x8x8xbf16, #tpu.memory_space<vmem>>, %arg24: memref<4x8x8xbf16, #tpu.memory_space<vmem>>, %arg25: memref<4x8x1xf32, #tpu.memory_space<vmem>>, %arg26: memref<4x8x1xf32, #tpu.memory_space<vmem>>, %arg27: memref<4x8x8xf32, #tpu.memory_space<vmem>>) attributes {dimension_semantics = [#tpu.dimension_semantics<parallel>, #tpu.dimension_semantics<arbitrary>], iteration_bounds = array<i64: 2, 1>, scalar_prefetch = 0 : i64, scratch_operands = 7 : i64, tpu.core_type = #tpu.core_type<tc>, window_params = [{transform_indices = @transform_0, window_bounds = array<i64: 1, 8, 32>}, {transform_indices = @transform_1, window_bounds = array<i64: 1, 8, 32>}, {pipeline_mode = #tpu.pipeline_mode<synchronous>, transform_indices = @transform_2, window_bounds = array<i64: 1, 32>}, {pipeline_mode = #tpu.pipeline_mode<synchronous>, transform_indices = @transform_3, window_bounds = array<i64: 1, 32>}, {pipeline_mode = #tpu.pipeline_mode<synchronous>, transform_indices = @transform_4, window_bounds = array<i64: 32, 32>}, {pipeline_mode = #tpu.pipeline_mode<synchronous>, transform_indices = @transform_5, window_bounds = array<i64: 1, 32>}, {pipeline_mode = #tpu.pipeline_mode<synchronous>, transform_indices = @transform_6, window_bounds = array<i64: 32, 32>}, {pipeline_mode = #tpu.pipeline_mode<synchronous>, transform_indices = @transform_7, window_bounds = array<i64: 1, 32>}, {pipeline_mode = #tpu.pipeline_mode<synchronous>, transform_indices = @transform_8, window_bounds = array<i64: 32, 32>}, {pipeline_mode = #tpu.pipeline_mode<synchronous>, transform_indices = @transform_9, window_bounds = array<i64: 1, 32>}, {pipeline_mode = #tpu.pipeline_mode<synchronous>, transform_indices = @transform_10, window_bounds = array<i64: 32, 32>}, {pipeline_mode = #tpu.pipeline_mode<synchronous>, transform_indices = @transform_11, window_bounds = array<i64: 1, 32>}, {pipeline_mode = #tpu.pipeline_mode<synchronous>, transform_indices = @transform_12, window_bounds = array<i64: 1, 32>}, {pipeline_mode = #tpu.pipeline_mode<synchronous>, transform_indices = @transform_13, window_bounds = array<i64: 1, 32>}, {pipeline_mode = #tpu.pipeline_mode<synchronous>, transform_indices = @transform_14, window_bounds = array<i64: 32, 128>}, {pipeline_mode = #tpu.pipeline_mode<synchronous>, transform_indices = @transform_15, window_bounds = array<i64: 1, 128>}, {pipeline_mode = #tpu.pipeline_mode<synchronous>, transform_indices = @transform_16, window_bounds = array<i64: 128, 32>}, {pipeline_mode = #tpu.pipeline_mode<synchronous>, transform_indices = @transform_17, window_bounds = array<i64: 1, 32>}, {transform_indices = @transform_18, window_bounds = array<i64: 1, 8, 32>}]} {
    %c8_i32 = arith.constant 8 : i32
    %0 = arith.muli %arg1, %c8_i32 : i32
    %1 = tpu.assume_multiple %0, 8 : i32
    %c0 = arith.constant 0 : index
    %c0_0 = arith.constant 0 : index
    %2 = vector.load %arg4[%c0, %c0_0] : memref<1x32xf32, #tpu.memory_space<vmem>>, vector<1x32xf32>
    %c0_1 = arith.constant 0 : index
    %c0_2 = arith.constant 0 : index
    %3 = vector.load %arg5[%c0_1, %c0_2] : memref<1x32xf32, #tpu.memory_space<vmem>>, vector<1x32xf32>
    %c0_i32 = arith.constant 0 : i32
    %4 = arith.cmpi eq, %arg1, %c0_i32 : i32
    %5 = arith.extui %4 : i1 to i32
    %c0_i32_3 = arith.constant 0 : i32
    %6 = arith.cmpi ne, %5, %c0_i32_3 : i32
    scf.if %6 {
      %c0_97 = arith.constant 0 : index
      %c0_98 = arith.constant 0 : index
      %c0_99 = arith.constant 0 : index
      %138 = vector.load %arg2[%c0_97, %c0_98, %c0_99] : memref<1x8x32xf32, #tpu.memory_space<vmem>>, vector<1x8x32xf32>
      %139 = vector.shape_cast %138 : vector<1x8x32xf32> to vector<8x32xf32>
      %cst_100 = arith.constant dense<0.000000e+00> : vector<8xf32>
      %140 = vector.multi_reduction <add>, %139, %cst_100 [1] : vector<8x32xf32> to vector<8xf32>
      %141 = vector.shape_cast %140 : vector<8xf32> to vector<8x1xf32>
      %cst_101 = arith.constant 3.200000e+01 : f32
      %142 = vector.broadcast %cst_101 : f32 to vector<8x1xf32>
      %143 = arith.divf %141, %142 : vector<8x1xf32>
      %144 = vector.broadcast %143 : vector<8x1xf32> to vector<8x32xf32>
      %145 = arith.subf %139, %144 : vector<8x32xf32>
      %146 = arith.mulf %145, %145 : vector<8x32xf32>
      %cst_102 = arith.constant dense<0.000000e+00> : vector<8xf32>
      %147 = vector.multi_reduction <add>, %146, %cst_102 [1] : vector<8x32xf32> to vector<8xf32>
      %148 = vector.shape_cast %147 : vector<8xf32> to vector<8x1xf32>
      %cst_103 = arith.constant 3.200000e+01 : f32
      %149 = vector.broadcast %cst_103 : f32 to vector<8x1xf32>
      %150 = arith.divf %148, %149 : vector<8x1xf32>
      %cst_104 = arith.constant 9.99999974E-6 : f32
      %151 = vector.broadcast %cst_104 : f32 to vector<8x1xf32>
      %152 = arith.addf %150, %151 : vector<8x1xf32>
      %153 = math.rsqrt %152 : vector<8x1xf32>
      %154 = vector.broadcast %153 : vector<8x1xf32> to vector<8x32xf32>
      %155 = arith.mulf %145, %154 : vector<8x32xf32>
      %156 = vector.broadcast %2 : vector<1x32xf32> to vector<8x32xf32>
      %157 = arith.mulf %156, %155 : vector<8x32xf32>
      %158 = vector.broadcast %3 : vector<1x32xf32> to vector<8x32xf32>
      %159 = arith.addf %157, %158 : vector<8x32xf32>
      %160 = arith.truncf %159 : vector<8x32xf32> to vector<8x32xbf16>
      %c0_105 = arith.constant 0 : index
      %c0_106 = arith.constant 0 : index
      %161 = vector.load %arg21[%c0_105, %c0_106] : memref<8x32xbf16, #tpu.memory_space<vmem>>, vector<8x32xbf16>
      tpu.vector_store %arg21[%c0_105, %c0_106], %160 {strides = array<i32>} : memref<8x32xbf16, #tpu.memory_space<vmem>>, vector<8x32xbf16>,
      %c0_107 = arith.constant 0 : index
      %c0_108 = arith.constant 0 : index
      %162 = vector.load %arg8[%c0_107, %c0_108] : memref<32x32xbf16, #tpu.memory_space<vmem>>, vector<32x32xbf16>
      %cst_109 = arith.constant dense<0.000000e+00> : vector<8x32xf32>
      %163 = tpu.matmul %160, %162, %cst_109 {dimension_numbers = #tpu.dot_dimension_numbers<[1], [0], [0], [1], [0, 0, 1, 1], [], []>} : vector<8x32xbf16>, vector<32x32xbf16>, vector<8x32xf32> -> vector<8x32xf32>
      %c0_110 = arith.constant 0 : index
      %c0_111 = arith.constant 0 : index
      %164 = vector.load %arg9[%c0_110, %c0_111] : memref<1x32xf32, #tpu.memory_space<vmem>>, vector<1x32xf32>
      %165 = vector.broadcast %164 : vector<1x32xf32> to vector<8x32xf32>
      %166 = arith.addf %163, %165 : vector<8x32xf32>
      %167 = arith.truncf %166 : vector<8x32xf32> to vector<8x32xbf16>
      %c0_112 = arith.constant 0 : index
      %c0_113 = arith.constant 0 : index
      %168 = vector.load %arg10[%c0_112, %c0_113] : memref<32x32xbf16, #tpu.memory_space<vmem>>, vector<32x32xbf16>
      %cst_114 = arith.constant dense<0.000000e+00> : vector<8x32xf32>
      %169 = tpu.matmul %160, %168, %cst_114 {dimension_numbers = #tpu.dot_dimension_numbers<[1], [0], [0], [1], [0, 0, 1, 1], [], []>} : vector<8x32xbf16>, vector<32x32xbf16>, vector<8x32xf32> -> vector<8x32xf32>
      %c0_115 = arith.constant 0 : index
      %c0_116 = arith.constant 0 : index
      %170 = vector.load %arg11[%c0_115, %c0_116] : memref<1x32xf32, #tpu.memory_space<vmem>>, vector<1x32xf32>
      %171 = vector.broadcast %170 : vector<1x32xf32> to vector<8x32xf32>
      %172 = arith.addf %169, %171 : vector<8x32xf32>
      %173 = arith.truncf %172 : vector<8x32xf32> to vector<8x32xbf16>
      %174 = vector.extract_strided_slice %167 {offsets = [0, 0], sizes = [8, 8], strides = [1, 1]} : vector<8x32xbf16> to vector<8x8xbf16>
      %c0_117 = arith.constant 0 : index
      %c0_118 = arith.constant 0 : index
      %c0_119 = arith.constant 0 : index
      %175 = vector.load %arg23[%c0_117, %c0_118, %c0_119] : memref<4x8x8xbf16, #tpu.memory_space<vmem>>, vector<1x8x8xbf16>
      %176 = vector.shape_cast %175 : vector<1x8x8xbf16> to vector<8x8xbf16>
      %177 = vector.shape_cast %174 : vector<8x8xbf16> to vector<1x8x8xbf16>
      tpu.vector_store %arg23[%c0_117, %c0_118, %c0_119], %177 {strides = array<i32>} : memref<4x8x8xbf16, #tpu.memory_space<vmem>>, vector<1x8x8xbf16>,
      %178 = vector.extract_strided_slice %173 {offsets = [0, 0], sizes = [8, 8], strides = [1, 1]} : vector<8x32xbf16> to vector<8x8xbf16>
      %c0_120 = arith.constant 0 : index
      %c0_121 = arith.constant 0 : index
      %c0_122 = arith.constant 0 : index
      %179 = vector.load %arg24[%c0_120, %c0_121, %c0_122] : memref<4x8x8xbf16, #tpu.memory_space<vmem>>, vector<1x8x8xbf16>
      %180 = vector.shape_cast %179 : vector<1x8x8xbf16> to vector<8x8xbf16>
      %181 = vector.shape_cast %178 : vector<8x8xbf16> to vector<1x8x8xbf16>
      tpu.vector_store %arg24[%c0_120, %c0_121, %c0_122], %181 {strides = array<i32>} : memref<4x8x8xbf16, #tpu.memory_space<vmem>>, vector<1x8x8xbf16>,
      %182 = vector.extract_strided_slice %167 {offsets = [0, 8], sizes = [8, 8], strides = [1, 1]} : vector<8x32xbf16> to vector<8x8xbf16>
      %c1_123 = arith.constant 1 : index
      %c0_124 = arith.constant 0 : index
      %c0_125 = arith.constant 0 : index
      %183 = vector.load %arg23[%c1_123, %c0_124, %c0_125] : memref<4x8x8xbf16, #tpu.memory_space<vmem>>, vector<1x8x8xbf16>
      %184 = vector.shape_cast %183 : vector<1x8x8xbf16> to vector<8x8xbf16>
      %185 = vector.shape_cast %182 : vector<8x8xbf16> to vector<1x8x8xbf16>
      tpu.vector_store %arg23[%c1_123, %c0_124, %c0_125], %185 {strides = array<i32>} : memref<4x8x8xbf16, #tpu.memory_space<vmem>>, vector<1x8x8xbf16>,
      %186 = vector.extract_strided_slice %173 {offsets = [0, 8], sizes = [8, 8], strides = [1, 1]} : vector<8x32xbf16> to vector<8x8xbf16>
      %c1_126 = arith.constant 1 : index
      %c0_127 = arith.constant 0 : index
      %c0_128 = arith.constant 0 : index
      %187 = vector.load %arg24[%c1_126, %c0_127, %c0_128] : memref<4x8x8xbf16, #tpu.memory_space<vmem>>, vector<1x8x8xbf16>
      %188 = vector.shape_cast %187 : vector<1x8x8xbf16> to vector<8x8xbf16>
      %189 = vector.shape_cast %186 : vector<8x8xbf16> to vector<1x8x8xbf16>
      tpu.vector_store %arg24[%c1_126, %c0_127, %c0_128], %189 {strides = array<i32>} : memref<4x8x8xbf16, #tpu.memory_space<vmem>>, vector<1x8x8xbf16>,
      %190 = vector.extract_strided_slice %167 {offsets = [0, 16], sizes = [8, 8], strides = [1, 1]} : vector<8x32xbf16> to vector<8x8xbf16>
      %c2_129 = arith.constant 2 : index
      %c0_130 = arith.constant 0 : index
      %c0_131 = arith.constant 0 : index
      %191 = vector.load %arg23[%c2_129, %c0_130, %c0_131] : memref<4x8x8xbf16, #tpu.memory_space<vmem>>, vector<1x8x8xbf16>
      %192 = vector.shape_cast %191 : vector<1x8x8xbf16> to vector<8x8xbf16>
      %193 = vector.shape_cast %190 : vector<8x8xbf16> to vector<1x8x8xbf16>
      tpu.vector_store %arg23[%c2_129, %c0_130, %c0_131], %193 {strides = array<i32>} : memref<4x8x8xbf16, #tpu.memory_space<vmem>>, vector<1x8x8xbf16>,
      %194 = vector.extract_strided_slice %173 {offsets = [0, 16], sizes = [8, 8], strides = [1, 1]} : vector<8x32xbf16> to vector<8x8xbf16>
      %c2_132 = arith.constant 2 : index
      %c0_133 = arith.constant 0 : index
      %c0_134 = arith.constant 0 : index
      %195 = vector.load %arg24[%c2_132, %c0_133, %c0_134] : memref<4x8x8xbf16, #tpu.memory_space<vmem>>, vector<1x8x8xbf16>
      %196 = vector.shape_cast %195 : vector<1x8x8xbf16> to vector<8x8xbf16>
      %197 = vector.shape_cast %194 : vector<8x8xbf16> to vector<1x8x8xbf16>
      tpu.vector_store %arg24[%c2_132, %c0_133, %c0_134], %197 {strides = array<i32>} : memref<4x8x8xbf16, #tpu.memory_space<vmem>>, vector<1x8x8xbf16>,
      %198 = vector.extract_strided_slice %167 {offsets = [0, 24], sizes = [8, 8], strides = [1, 1]} : vector<8x32xbf16> to vector<8x8xbf16>
      %c3_135 = arith.constant 3 : index
      %c0_136 = arith.constant 0 : index
      %c0_137 = arith.constant 0 : index
      %199 = vector.load %arg23[%c3_135, %c0_136, %c0_137] : memref<4x8x8xbf16, #tpu.memory_space<vmem>>, vector<1x8x8xbf16>
      %200 = vector.shape_cast %199 : vector<1x8x8xbf16> to vector<8x8xbf16>
      %201 = vector.shape_cast %198 : vector<8x8xbf16> to vector<1x8x8xbf16>
      tpu.vector_store %arg23[%c3_135, %c0_136, %c0_137], %201 {strides = array<i32>} : memref<4x8x8xbf16, #tpu.memory_space<vmem>>, vector<1x8x8xbf16>,
      %202 = vector.extract_strided_slice %173 {offsets = [0, 24], sizes = [8, 8], strides = [1, 1]} : vector<8x32xbf16> to vector<8x8xbf16>
      %c3_138 = arith.constant 3 : index
      %c0_139 = arith.constant 0 : index
      %c0_140 = arith.constant 0 : index
      %203 = vector.load %arg24[%c3_138, %c0_139, %c0_140] : memref<4x8x8xbf16, #tpu.memory_space<vmem>>, vector<1x8x8xbf16>
      %204 = vector.shape_cast %203 : vector<1x8x8xbf16> to vector<8x8xbf16>
      %205 = vector.shape_cast %202 : vector<8x8xbf16> to vector<1x8x8xbf16>
      tpu.vector_store %arg24[%c3_138, %c0_139, %c0_140], %205 {strides = array<i32>} : memref<4x8x8xbf16, #tpu.memory_space<vmem>>, vector<1x8x8xbf16>,
    } else {
    }
    %7 = arith.index_cast %1 : i32 to index
    %c0_4 = arith.constant 0 : index
    %8 = vector.load %arg21[%7, %c0_4] : memref<8x32xbf16, #tpu.memory_space<vmem>>, vector<8x32xbf16>
    %c0_5 = arith.constant 0 : index
    %c0_6 = arith.constant 0 : index
    %9 = vector.load %arg6[%c0_5, %c0_6] : memref<32x32xbf16, #tpu.memory_space<vmem>>, vector<32x32xbf16>
    %cst = arith.constant dense<0.000000e+00> : vector<8x32xf32>
    %10 = tpu.matmul %8, %9, %cst {dimension_numbers = #tpu.dot_dimension_numbers<[1], [0], [0], [1], [0, 0, 1, 1], [], []>} : vector<8x32xbf16>, vector<32x32xbf16>, vector<8x32xf32> -> vector<8x32xf32>
    %c0_7 = arith.constant 0 : index
    %c0_8 = arith.constant 0 : index
    %11 = vector.load %arg7[%c0_7, %c0_8] : memref<1x32xf32, #tpu.memory_space<vmem>>, vector<1x32xf32>
    %12 = vector.broadcast %11 : vector<1x32xf32> to vector<8x32xf32>
    %13 = arith.addf %10, %12 : vector<8x32xf32>
    %14 = arith.truncf %13 : vector<8x32xf32> to vector<8x32xbf16>
    %15 = vector.extract_strided_slice %14 {offsets = [0, 0], sizes = [8, 8], strides = [1, 1]} : vector<8x32xbf16> to vector<8x8xbf16>
    %c0_9 = arith.constant 0 : index
    %c0_10 = arith.constant 0 : index
    %c0_11 = arith.constant 0 : index
    %16 = vector.load %arg22[%c0_9, %c0_10, %c0_11] : memref<4x8x8xbf16, #tpu.memory_space<vmem>>, vector<1x8x8xbf16>
    %17 = vector.shape_cast %16 : vector<1x8x8xbf16> to vector<8x8xbf16>
    %18 = vector.shape_cast %15 : vector<8x8xbf16> to vector<1x8x8xbf16>
    tpu.vector_store %arg22[%c0_9, %c0_10, %c0_11], %18 {strides = array<i32>} : memref<4x8x8xbf16, #tpu.memory_space<vmem>>, vector<1x8x8xbf16>,
    %19 = vector.extract_strided_slice %14 {offsets = [0, 8], sizes = [8, 8], strides = [1, 1]} : vector<8x32xbf16> to vector<8x8xbf16>
    %c1 = arith.constant 1 : index
    %c0_12 = arith.constant 0 : index
    %c0_13 = arith.constant 0 : index
    %20 = vector.load %arg22[%c1, %c0_12, %c0_13] : memref<4x8x8xbf16, #tpu.memory_space<vmem>>, vector<1x8x8xbf16>
    %21 = vector.shape_cast %20 : vector<1x8x8xbf16> to vector<8x8xbf16>
    %22 = vector.shape_cast %19 : vector<8x8xbf16> to vector<1x8x8xbf16>
    tpu.vector_store %arg22[%c1, %c0_12, %c0_13], %22 {strides = array<i32>} : memref<4x8x8xbf16, #tpu.memory_space<vmem>>, vector<1x8x8xbf16>,
    %23 = vector.extract_strided_slice %14 {offsets = [0, 16], sizes = [8, 8], strides = [1, 1]} : vector<8x32xbf16> to vector<8x8xbf16>
    %c2 = arith.constant 2 : index
    %c0_14 = arith.constant 0 : index
    %c0_15 = arith.constant 0 : index
    %24 = vector.load %arg22[%c2, %c0_14, %c0_15] : memref<4x8x8xbf16, #tpu.memory_space<vmem>>, vector<1x8x8xbf16>
    %25 = vector.shape_cast %24 : vector<1x8x8xbf16> to vector<8x8xbf16>
    %26 = vector.shape_cast %23 : vector<8x8xbf16> to vector<1x8x8xbf16>
    tpu.vector_store %arg22[%c2, %c0_14, %c0_15], %26 {strides = array<i32>} : memref<4x8x8xbf16, #tpu.memory_space<vmem>>, vector<1x8x8xbf16>,
    %27 = vector.extract_strided_slice %14 {offsets = [0, 24], sizes = [8, 8], strides = [1, 1]} : vector<8x32xbf16> to vector<8x8xbf16>
    %c3 = arith.constant 3 : index
    %c0_16 = arith.constant 0 : index
    %c0_17 = arith.constant 0 : index
    %28 = vector.load %arg22[%c3, %c0_16, %c0_17] : memref<4x8x8xbf16, #tpu.memory_space<vmem>>, vector<1x8x8xbf16>
    %29 = vector.shape_cast %28 : vector<1x8x8xbf16> to vector<8x8xbf16>
    %30 = vector.shape_cast %27 : vector<8x8xbf16> to vector<1x8x8xbf16>
    tpu.vector_store %arg22[%c3, %c0_16, %c0_17], %30 {strides = array<i32>} : memref<4x8x8xbf16, #tpu.memory_space<vmem>>, vector<1x8x8xbf16>,
    %cst_18 = arith.constant 0xFF800000 : f32
    %31 = vector.broadcast %cst_18 : f32 to vector<4x8x1xf32>
    %c0_19 = arith.constant 0 : index
    %c0_20 = arith.constant 0 : index
    %c0_21 = arith.constant 0 : index
    %32 = vector.load %arg25[%c0_19, %c0_20, %c0_21] : memref<4x8x1xf32, #tpu.memory_space<vmem>>, vector<4x8x1xf32>
    tpu.vector_store %arg25[%c0_19, %c0_20, %c0_21], %31 {strides = array<i32>} : memref<4x8x1xf32, #tpu.memory_space<vmem>>, vector<4x8x1xf32>,
    %cst_22 = arith.constant 0.000000e+00 : f32
    %33 = vector.broadcast %cst_22 : f32 to vector<4x8x1xf32>
    %c0_23 = arith.constant 0 : index
    %c0_24 = arith.constant 0 : index
    %c0_25 = arith.constant 0 : index
    %34 = vector.load %arg26[%c0_23, %c0_24, %c0_25] : memref<4x8x1xf32, #tpu.memory_space<vmem>>, vector<4x8x1xf32>
    tpu.vector_store %arg26[%c0_23, %c0_24, %c0_25], %33 {strides = array<i32>} : memref<4x8x1xf32, #tpu.memory_space<vmem>>, vector<4x8x1xf32>,
    %cst_26 = arith.constant 0.000000e+00 : f32
    %35 = vector.broadcast %cst_26 : f32 to vector<4x8x8xf32>
    %c0_27 = arith.constant 0 : index
    %c0_28 = arith.constant 0 : index
    %c0_29 = arith.constant 0 : index
    %36 = vector.load %arg27[%c0_27, %c0_28, %c0_29] : memref<4x8x8xf32, #tpu.memory_space<vmem>>, vector<4x8x8xf32>
    tpu.vector_store %arg27[%c0_27, %c0_28, %c0_29], %35 {strides = array<i32>} : memref<4x8x8xf32, #tpu.memory_space<vmem>>, vector<4x8x8xf32>,
    %37 = tpu.iota {dimensions = array<i32: 0>} : vector<8x8xi32>
    %38 = vector.broadcast %1 : i32 to vector<8x8xi32>
    %39 = arith.addi %37, %38 : vector<8x8xi32>
    %40 = tpu.iota {dimensions = array<i32: 1>} : vector<8x8xi32>
    %c1_i32 = arith.constant 1 : i32
    %41 = arith.addi %arg1, %c1_i32 : i32
    %c0_i32_30 = arith.constant 0 : i32
    %42 = arith.subi %41, %c0_i32_30 : i32
    %c1_i32_31 = arith.constant 1 : i32
    %c1_i32_32 = arith.constant 1 : i32
    %43 = arith.subi %c1_i32_31, %c1_i32_32 : i32
    %44 = arith.addi %42, %43 : i32
    %c1_i32_33 = arith.constant 1 : i32
    %45 = arith.divsi %44, %c1_i32_33 : i32
    %c1_i32_34 = arith.constant 1 : i32
    %c0_i32_35 = arith.constant 0 : i32
    %cst_36 = arith.constant 0.353553385 : f32
    %c0_i32_37 = arith.constant 0 : i32
    %46 = arith.subi %45, %c0_i32_37 : i32
    %47 = arith.addi %c0_i32_37, %46 : i32
    %c1_i32_38 = arith.constant 1 : i32
    scf.for %arg28 = %c0_i32_37 to %47 step %c1_i32_38  : i32 {
      %138 = arith.muli %arg28, %c1_i32_34 : i32
      %139 = arith.addi %c0_i32_35, %138 : i32
      %c8_i32_97 = arith.constant 8 : i32
      %140 = arith.muli %139, %c8_i32_97 : i32
      %141 = tpu.assume_multiple %140, 8 : i32
      %142 = vector.broadcast %141 : i32 to vector<8x8xi32>
      %143 = arith.addi %40, %142 : vector<8x8xi32>
      %144 = arith.cmpi sge, %39, %143 : vector<8x8xi32>
      %c0_98 = arith.constant 0 : index
      %c0_99 = arith.constant 0 : index
      %c0_100 = arith.constant 0 : index
      %145 = vector.load %arg22[%c0_98, %c0_99, %c0_100] : memref<4x8x8xbf16, #tpu.memory_space<vmem>>, vector<1x8x8xbf16>
      %146 = vector.shape_cast %145 : vector<1x8x8xbf16> to vector<8x8xbf16>
      %c0_101 = arith.constant 0 : index
      %147 = arith.index_cast %141 : i32 to index
      %c0_102 = arith.constant 0 : index
      %148 = vector.load %arg23[%c0_101, %147, %c0_102] : memref<4x8x8xbf16, #tpu.memory_space<vmem>>, vector<1x8x8xbf16>
      %149 = vector.shape_cast %148 : vector<1x8x8xbf16> to vector<8x8xbf16>
      %c0_103 = arith.constant 0 : index
      %150 = arith.index_cast %141 : i32 to index
      %c0_104 = arith.constant 0 : index
      %151 = vector.load %arg24[%c0_103, %150, %c0_104] : memref<4x8x8xbf16, #tpu.memory_space<vmem>>, vector<1x8x8xbf16>
      %152 = vector.shape_cast %151 : vector<1x8x8xbf16> to vector<8x8xbf16>
      %cst_105 = arith.constant dense<0.000000e+00> : vector<8x8xf32>
      %153 = tpu.matmul %146, %149, %cst_105 {dimension_numbers = #tpu.dot_dimension_numbers<[1], [1], [0], [0], [0, 0, 1, 0], [], []>} : vector<8x8xbf16>, vector<8x8xbf16>, vector<8x8xf32> -> vector<8x8xf32>
      %154 = vector.broadcast %cst_36 : f32 to vector<8x8xf32>
      %155 = arith.mulf %153, %154 : vector<8x8xf32>
      %cst_106 = arith.constant -1.000000e+09 : f32
      %156 = vector.broadcast %cst_106 : f32 to vector<8x8xf32>
      %157 = arith.select %144, %155, %156 : vector<8x8xi1>, vector<8x8xf32>
      %c0_107 = arith.constant 0 : index
      %c0_108 = arith.constant 0 : index
      %c0_109 = arith.constant 0 : index
      %158 = vector.load %arg25[%c0_107, %c0_108, %c0_109] : memref<4x8x1xf32, #tpu.memory_space<vmem>>, vector<1x8x1xf32>
      %159 = vector.shape_cast %158 : vector<1x8x1xf32> to vector<8x1xf32>
      %cst_110 = arith.constant dense<0xFF800000> : vector<8xf32>
      %160 = vector.multi_reduction <maximumf>, %157, %cst_110 [1] : vector<8x8xf32> to vector<8xf32>
      %161 = vector.shape_cast %160 : vector<8xf32> to vector<8x1xf32>
      %162 = arith.maximumf %159, %161 : vector<8x1xf32>
      %163 = arith.subf %159, %162 : vector<8x1xf32>
      %164 = math.exp %163 : vector<8x1xf32>
      %165 = vector.broadcast %162 : vector<8x1xf32> to vector<8x8xf32>
      %166 = arith.subf %157, %165 : vector<8x8xf32>
      %167 = math.exp %166 : vector<8x8xf32>
      %c0_111 = arith.constant 0 : index
      %c0_112 = arith.constant 0 : index
      %c0_113 = arith.constant 0 : index
      %168 = vector.load %arg26[%c0_111, %c0_112, %c0_113] : memref<4x8x1xf32, #tpu.memory_space<vmem>>, vector<1x8x1xf32>
      %169 = vector.shape_cast %168 : vector<1x8x1xf32> to vector<8x1xf32>
      %170 = arith.mulf %164, %169 : vector<8x1xf32>
      %cst_114 = arith.constant dense<0.000000e+00> : vector<8xf32>
      %171 = vector.multi_reduction <add>, %167, %cst_114 [1] : vector<8x8xf32> to vector<8xf32>
      %172 = vector.shape_cast %171 : vector<8xf32> to vector<8x1xf32>
      %173 = arith.addf %170, %172 : vector<8x1xf32>
      %c0_115 = arith.constant 0 : index
      %c0_116 = arith.constant 0 : index
      %c0_117 = arith.constant 0 : index
      %174 = vector.load %arg26[%c0_115, %c0_116, %c0_117] : memref<4x8x1xf32, #tpu.memory_space<vmem>>, vector<1x8x1xf32>
      %175 = vector.shape_cast %174 : vector<1x8x1xf32> to vector<8x1xf32>
      %176 = vector.shape_cast %173 : vector<8x1xf32> to vector<1x8x1xf32>
      tpu.vector_store %arg26[%c0_115, %c0_116, %c0_117], %176 {strides = array<i32>} : memref<4x8x1xf32, #tpu.memory_space<vmem>>, vector<1x8x1xf32>,
      %c0_118 = arith.constant 0 : index
      %c0_119 = arith.constant 0 : index
      %c0_120 = arith.constant 0 : index
      %177 = vector.load %arg27[%c0_118, %c0_119, %c0_120] : memref<4x8x8xf32, #tpu.memory_space<vmem>>, vector<1x8x8xf32>
      %178 = vector.shape_cast %177 : vector<1x8x8xf32> to vector<8x8xf32>
      %179 = vector.broadcast %164 : vector<8x1xf32> to vector<8x8xf32>
      %180 = arith.mulf %179, %178 : vector<8x8xf32>
      %181 = arith.truncf %167 : vector<8x8xf32> to vector<8x8xbf16>
      %cst_121 = arith.constant dense<0.000000e+00> : vector<8x8xf32>
      %182 = tpu.matmul %181, %152, %cst_121 {dimension_numbers = #tpu.dot_dimension_numbers<[1], [0], [0], [1], [0, 0, 1, 1], [], []>} : vector<8x8xbf16>, vector<8x8xbf16>, vector<8x8xf32> -> vector<8x8xf32>
      %183 = arith.addf %180, %182 : vector<8x8xf32>
      %c0_122 = arith.constant 0 : index
      %c0_123 = arith.constant 0 : index
      %c0_124 = arith.constant 0 : index
      %184 = vector.load %arg27[%c0_122, %c0_123, %c0_124] : memref<4x8x8xf32, #tpu.memory_space<vmem>>, vector<1x8x8xf32>
      %185 = vector.shape_cast %184 : vector<1x8x8xf32> to vector<8x8xf32>
      %186 = vector.shape_cast %183 : vector<8x8xf32> to vector<1x8x8xf32>
      tpu.vector_store %arg27[%c0_122, %c0_123, %c0_124], %186 {strides = array<i32>} : memref<4x8x8xf32, #tpu.memory_space<vmem>>, vector<1x8x8xf32>,
      %c0_125 = arith.constant 0 : index
      %c0_126 = arith.constant 0 : index
      %c0_127 = arith.constant 0 : index
      %187 = vector.load %arg25[%c0_125, %c0_126, %c0_127] : memref<4x8x1xf32, #tpu.memory_space<vmem>>, vector<1x8x1xf32>
      %188 = vector.shape_cast %187 : vector<1x8x1xf32> to vector<8x1xf32>
      %189 = vector.shape_cast %162 : vector<8x1xf32> to vector<1x8x1xf32>
      tpu.vector_store %arg25[%c0_125, %c0_126, %c0_127], %189 {strides = array<i32>} : memref<4x8x1xf32, #tpu.memory_space<vmem>>, vector<1x8x1xf32>,
      %c1_128 = arith.constant 1 : index
      %c0_129 = arith.constant 0 : index
      %c0_130 = arith.constant 0 : index
      %190 = vector.load %arg22[%c1_128, %c0_129, %c0_130] : memref<4x8x8xbf16, #tpu.memory_space<vmem>>, vector<1x8x8xbf16>
      %191 = vector.shape_cast %190 : vector<1x8x8xbf16> to vector<8x8xbf16>
      %c1_131 = arith.constant 1 : index
      %192 = arith.index_cast %141 : i32 to index
      %c0_132 = arith.constant 0 : index
      %193 = vector.load %arg23[%c1_131, %192, %c0_132] : memref<4x8x8xbf16, #tpu.memory_space<vmem>>, vector<1x8x8xbf16>
      %194 = vector.shape_cast %193 : vector<1x8x8xbf16> to vector<8x8xbf16>
      %c1_133 = arith.constant 1 : index
      %195 = arith.index_cast %141 : i32 to index
      %c0_134 = arith.constant 0 : index
      %196 = vector.load %arg24[%c1_133, %195, %c0_134] : memref<4x8x8xbf16, #tpu.memory_space<vmem>>, vector<1x8x8xbf16>
      %197 = vector.shape_cast %196 : vector<1x8x8xbf16> to vector<8x8xbf16>
      %cst_135 = arith.constant dense<0.000000e+00> : vector<8x8xf32>
      %198 = tpu.matmul %191, %194, %cst_135 {dimension_numbers = #tpu.dot_dimension_numbers<[1], [1], [0], [0], [0, 0, 1, 0], [], []>} : vector<8x8xbf16>, vector<8x8xbf16>, vector<8x8xf32> -> vector<8x8xf32>
      %199 = vector.broadcast %cst_36 : f32 to vector<8x8xf32>
      %200 = arith.mulf %198, %199 : vector<8x8xf32>
      %cst_136 = arith.constant -1.000000e+09 : f32
      %201 = vector.broadcast %cst_136 : f32 to vector<8x8xf32>
      %202 = arith.select %144, %200, %201 : vector<8x8xi1>, vector<8x8xf32>
      %c1_137 = arith.constant 1 : index
      %c0_138 = arith.constant 0 : index
      %c0_139 = arith.constant 0 : index
      %203 = vector.load %arg25[%c1_137, %c0_138, %c0_139] : memref<4x8x1xf32, #tpu.memory_space<vmem>>, vector<1x8x1xf32>
      %204 = vector.shape_cast %203 : vector<1x8x1xf32> to vector<8x1xf32>
      %cst_140 = arith.constant dense<0xFF800000> : vector<8xf32>
      %205 = vector.multi_reduction <maximumf>, %202, %cst_140 [1] : vector<8x8xf32> to vector<8xf32>
      %206 = vector.shape_cast %205 : vector<8xf32> to vector<8x1xf32>
      %207 = arith.maximumf %204, %206 : vector<8x1xf32>
      %208 = arith.subf %204, %207 : vector<8x1xf32>
      %209 = math.exp %208 : vector<8x1xf32>
      %210 = vector.broadcast %207 : vector<8x1xf32> to vector<8x8xf32>
      %211 = arith.subf %202, %210 : vector<8x8xf32>
      %212 = math.exp %211 : vector<8x8xf32>
      %c1_141 = arith.constant 1 : index
      %c0_142 = arith.constant 0 : index
      %c0_143 = arith.constant 0 : index
      %213 = vector.load %arg26[%c1_141, %c0_142, %c0_143] : memref<4x8x1xf32, #tpu.memory_space<vmem>>, vector<1x8x1xf32>
      %214 = vector.shape_cast %213 : vector<1x8x1xf32> to vector<8x1xf32>
      %215 = arith.mulf %209, %214 : vector<8x1xf32>
      %cst_144 = arith.constant dense<0.000000e+00> : vector<8xf32>
      %216 = vector.multi_reduction <add>, %212, %cst_144 [1] : vector<8x8xf32> to vector<8xf32>
      %217 = vector.shape_cast %216 : vector<8xf32> to vector<8x1xf32>
      %218 = arith.addf %215, %217 : vector<8x1xf32>
      %c1_145 = arith.constant 1 : index
      %c0_146 = arith.constant 0 : index
      %c0_147 = arith.constant 0 : index
      %219 = vector.load %arg26[%c1_145, %c0_146, %c0_147] : memref<4x8x1xf32, #tpu.memory_space<vmem>>, vector<1x8x1xf32>
      %220 = vector.shape_cast %219 : vector<1x8x1xf32> to vector<8x1xf32>
      %221 = vector.shape_cast %218 : vector<8x1xf32> to vector<1x8x1xf32>
      tpu.vector_store %arg26[%c1_145, %c0_146, %c0_147], %221 {strides = array<i32>} : memref<4x8x1xf32, #tpu.memory_space<vmem>>, vector<1x8x1xf32>,
      %c1_148 = arith.constant 1 : index
      %c0_149 = arith.constant 0 : index
      %c0_150 = arith.constant 0 : index
      %222 = vector.load %arg27[%c1_148, %c0_149, %c0_150] : memref<4x8x8xf32, #tpu.memory_space<vmem>>, vector<1x8x8xf32>
      %223 = vector.shape_cast %222 : vector<1x8x8xf32> to vector<8x8xf32>
      %224 = vector.broadcast %209 : vector<8x1xf32> to vector<8x8xf32>
      %225 = arith.mulf %224, %223 : vector<8x8xf32>
      %226 = arith.truncf %212 : vector<8x8xf32> to vector<8x8xbf16>
      %cst_151 = arith.constant dense<0.000000e+00> : vector<8x8xf32>
      %227 = tpu.matmul %226, %197, %cst_151 {dimension_numbers = #tpu.dot_dimension_numbers<[1], [0], [0], [1], [0, 0, 1, 1], [], []>} : vector<8x8xbf16>, vector<8x8xbf16>, vector<8x8xf32> -> vector<8x8xf32>
      %228 = arith.addf %225, %227 : vector<8x8xf32>
      %c1_152 = arith.constant 1 : index
      %c0_153 = arith.constant 0 : index
      %c0_154 = arith.constant 0 : index
      %229 = vector.load %arg27[%c1_152, %c0_153, %c0_154] : memref<4x8x8xf32, #tpu.memory_space<vmem>>, vector<1x8x8xf32>
      %230 = vector.shape_cast %229 : vector<1x8x8xf32> to vector<8x8xf32>
      %231 = vector.shape_cast %228 : vector<8x8xf32> to vector<1x8x8xf32>
      tpu.vector_store %arg27[%c1_152, %c0_153, %c0_154], %231 {strides = array<i32>} : memref<4x8x8xf32, #tpu.memory_space<vmem>>, vector<1x8x8xf32>,
      %c1_155 = arith.constant 1 : index
      %c0_156 = arith.constant 0 : index
      %c0_157 = arith.constant 0 : index
      %232 = vector.load %arg25[%c1_155, %c0_156, %c0_157] : memref<4x8x1xf32, #tpu.memory_space<vmem>>, vector<1x8x1xf32>
      %233 = vector.shape_cast %232 : vector<1x8x1xf32> to vector<8x1xf32>
      %234 = vector.shape_cast %207 : vector<8x1xf32> to vector<1x8x1xf32>
      tpu.vector_store %arg25[%c1_155, %c0_156, %c0_157], %234 {strides = array<i32>} : memref<4x8x1xf32, #tpu.memory_space<vmem>>, vector<1x8x1xf32>,
      %c2_158 = arith.constant 2 : index
      %c0_159 = arith.constant 0 : index
      %c0_160 = arith.constant 0 : index
      %235 = vector.load %arg22[%c2_158, %c0_159, %c0_160] : memref<4x8x8xbf16, #tpu.memory_space<vmem>>, vector<1x8x8xbf16>
      %236 = vector.shape_cast %235 : vector<1x8x8xbf16> to vector<8x8xbf16>
      %c2_161 = arith.constant 2 : index
      %237 = arith.index_cast %141 : i32 to index
      %c0_162 = arith.constant 0 : index
      %238 = vector.load %arg23[%c2_161, %237, %c0_162] : memref<4x8x8xbf16, #tpu.memory_space<vmem>>, vector<1x8x8xbf16>
      %239 = vector.shape_cast %238 : vector<1x8x8xbf16> to vector<8x8xbf16>
      %c2_163 = arith.constant 2 : index
      %240 = arith.index_cast %141 : i32 to index
      %c0_164 = arith.constant 0 : index
      %241 = vector.load %arg24[%c2_163, %240, %c0_164] : memref<4x8x8xbf16, #tpu.memory_space<vmem>>, vector<1x8x8xbf16>
      %242 = vector.shape_cast %241 : vector<1x8x8xbf16> to vector<8x8xbf16>
      %cst_165 = arith.constant dense<0.000000e+00> : vector<8x8xf32>
      %243 = tpu.matmul %236, %239, %cst_165 {dimension_numbers = #tpu.dot_dimension_numbers<[1], [1], [0], [0], [0, 0, 1, 0], [], []>} : vector<8x8xbf16>, vector<8x8xbf16>, vector<8x8xf32> -> vector<8x8xf32>
      %244 = vector.broadcast %cst_36 : f32 to vector<8x8xf32>
      %245 = arith.mulf %243, %244 : vector<8x8xf32>
      %cst_166 = arith.constant -1.000000e+09 : f32
      %246 = vector.broadcast %cst_166 : f32 to vector<8x8xf32>
      %247 = arith.select %144, %245, %246 : vector<8x8xi1>, vector<8x8xf32>
      %c2_167 = arith.constant 2 : index
      %c0_168 = arith.constant 0 : index
      %c0_169 = arith.constant 0 : index
      %248 = vector.load %arg25[%c2_167, %c0_168, %c0_169] : memref<4x8x1xf32, #tpu.memory_space<vmem>>, vector<1x8x1xf32>
      %249 = vector.shape_cast %248 : vector<1x8x1xf32> to vector<8x1xf32>
      %cst_170 = arith.constant dense<0xFF800000> : vector<8xf32>
      %250 = vector.multi_reduction <maximumf>, %247, %cst_170 [1] : vector<8x8xf32> to vector<8xf32>
      %251 = vector.shape_cast %250 : vector<8xf32> to vector<8x1xf32>
      %252 = arith.maximumf %249, %251 : vector<8x1xf32>
      %253 = arith.subf %249, %252 : vector<8x1xf32>
      %254 = math.exp %253 : vector<8x1xf32>
      %255 = vector.broadcast %252 : vector<8x1xf32> to vector<8x8xf32>
      %256 = arith.subf %247, %255 : vector<8x8xf32>
      %257 = math.exp %256 : vector<8x8xf32>
      %c2_171 = arith.constant 2 : index
      %c0_172 = arith.constant 0 : index
      %c0_173 = arith.constant 0 : index
      %258 = vector.load %arg26[%c2_171, %c0_172, %c0_173] : memref<4x8x1xf32, #tpu.memory_space<vmem>>, vector<1x8x1xf32>
      %259 = vector.shape_cast %258 : vector<1x8x1xf32> to vector<8x1xf32>
      %260 = arith.mulf %254, %259 : vector<8x1xf32>
      %cst_174 = arith.constant dense<0.000000e+00> : vector<8xf32>
      %261 = vector.multi_reduction <add>, %257, %cst_174 [1] : vector<8x8xf32> to vector<8xf32>
      %262 = vector.shape_cast %261 : vector<8xf32> to vector<8x1xf32>
      %263 = arith.addf %260, %262 : vector<8x1xf32>
      %c2_175 = arith.constant 2 : index
      %c0_176 = arith.constant 0 : index
      %c0_177 = arith.constant 0 : index
      %264 = vector.load %arg26[%c2_175, %c0_176, %c0_177] : memref<4x8x1xf32, #tpu.memory_space<vmem>>, vector<1x8x1xf32>
      %265 = vector.shape_cast %264 : vector<1x8x1xf32> to vector<8x1xf32>
      %266 = vector.shape_cast %263 : vector<8x1xf32> to vector<1x8x1xf32>
      tpu.vector_store %arg26[%c2_175, %c0_176, %c0_177], %266 {strides = array<i32>} : memref<4x8x1xf32, #tpu.memory_space<vmem>>, vector<1x8x1xf32>,
      %c2_178 = arith.constant 2 : index
      %c0_179 = arith.constant 0 : index
      %c0_180 = arith.constant 0 : index
      %267 = vector.load %arg27[%c2_178, %c0_179, %c0_180] : memref<4x8x8xf32, #tpu.memory_space<vmem>>, vector<1x8x8xf32>
      %268 = vector.shape_cast %267 : vector<1x8x8xf32> to vector<8x8xf32>
      %269 = vector.broadcast %254 : vector<8x1xf32> to vector<8x8xf32>
      %270 = arith.mulf %269, %268 : vector<8x8xf32>
      %271 = arith.truncf %257 : vector<8x8xf32> to vector<8x8xbf16>
      %cst_181 = arith.constant dense<0.000000e+00> : vector<8x8xf32>
      %272 = tpu.matmul %271, %242, %cst_181 {dimension_numbers = #tpu.dot_dimension_numbers<[1], [0], [0], [1], [0, 0, 1, 1], [], []>} : vector<8x8xbf16>, vector<8x8xbf16>, vector<8x8xf32> -> vector<8x8xf32>
      %273 = arith.addf %270, %272 : vector<8x8xf32>
      %c2_182 = arith.constant 2 : index
      %c0_183 = arith.constant 0 : index
      %c0_184 = arith.constant 0 : index
      %274 = vector.load %arg27[%c2_182, %c0_183, %c0_184] : memref<4x8x8xf32, #tpu.memory_space<vmem>>, vector<1x8x8xf32>
      %275 = vector.shape_cast %274 : vector<1x8x8xf32> to vector<8x8xf32>
      %276 = vector.shape_cast %273 : vector<8x8xf32> to vector<1x8x8xf32>
      tpu.vector_store %arg27[%c2_182, %c0_183, %c0_184], %276 {strides = array<i32>} : memref<4x8x8xf32, #tpu.memory_space<vmem>>, vector<1x8x8xf32>,
      %c2_185 = arith.constant 2 : index
      %c0_186 = arith.constant 0 : index
      %c0_187 = arith.constant 0 : index
      %277 = vector.load %arg25[%c2_185, %c0_186, %c0_187] : memref<4x8x1xf32, #tpu.memory_space<vmem>>, vector<1x8x1xf32>
      %278 = vector.shape_cast %277 : vector<1x8x1xf32> to vector<8x1xf32>
      %279 = vector.shape_cast %252 : vector<8x1xf32> to vector<1x8x1xf32>
      tpu.vector_store %arg25[%c2_185, %c0_186, %c0_187], %279 {strides = array<i32>} : memref<4x8x1xf32, #tpu.memory_space<vmem>>, vector<1x8x1xf32>,
      %c3_188 = arith.constant 3 : index
      %c0_189 = arith.constant 0 : index
      %c0_190 = arith.constant 0 : index
      %280 = vector.load %arg22[%c3_188, %c0_189, %c0_190] : memref<4x8x8xbf16, #tpu.memory_space<vmem>>, vector<1x8x8xbf16>
      %281 = vector.shape_cast %280 : vector<1x8x8xbf16> to vector<8x8xbf16>
      %c3_191 = arith.constant 3 : index
      %282 = arith.index_cast %141 : i32 to index
      %c0_192 = arith.constant 0 : index
      %283 = vector.load %arg23[%c3_191, %282, %c0_192] : memref<4x8x8xbf16, #tpu.memory_space<vmem>>, vector<1x8x8xbf16>
      %284 = vector.shape_cast %283 : vector<1x8x8xbf16> to vector<8x8xbf16>
      %c3_193 = arith.constant 3 : index
      %285 = arith.index_cast %141 : i32 to index
      %c0_194 = arith.constant 0 : index
      %286 = vector.load %arg24[%c3_193, %285, %c0_194] : memref<4x8x8xbf16, #tpu.memory_space<vmem>>, vector<1x8x8xbf16>
      %287 = vector.shape_cast %286 : vector<1x8x8xbf16> to vector<8x8xbf16>
      %cst_195 = arith.constant dense<0.000000e+00> : vector<8x8xf32>
      %288 = tpu.matmul %281, %284, %cst_195 {dimension_numbers = #tpu.dot_dimension_numbers<[1], [1], [0], [0], [0, 0, 1, 0], [], []>} : vector<8x8xbf16>, vector<8x8xbf16>, vector<8x8xf32> -> vector<8x8xf32>
      %289 = vector.broadcast %cst_36 : f32 to vector<8x8xf32>
      %290 = arith.mulf %288, %289 : vector<8x8xf32>
      %cst_196 = arith.constant -1.000000e+09 : f32
      %291 = vector.broadcast %cst_196 : f32 to vector<8x8xf32>
      %292 = arith.select %144, %290, %291 : vector<8x8xi1>, vector<8x8xf32>
      %c3_197 = arith.constant 3 : index
      %c0_198 = arith.constant 0 : index
      %c0_199 = arith.constant 0 : index
      %293 = vector.load %arg25[%c3_197, %c0_198, %c0_199] : memref<4x8x1xf32, #tpu.memory_space<vmem>>, vector<1x8x1xf32>
      %294 = vector.shape_cast %293 : vector<1x8x1xf32> to vector<8x1xf32>
      %cst_200 = arith.constant dense<0xFF800000> : vector<8xf32>
      %295 = vector.multi_reduction <maximumf>, %292, %cst_200 [1] : vector<8x8xf32> to vector<8xf32>
      %296 = vector.shape_cast %295 : vector<8xf32> to vector<8x1xf32>
      %297 = arith.maximumf %294, %296 : vector<8x1xf32>
      %298 = arith.subf %294, %297 : vector<8x1xf32>
      %299 = math.exp %298 : vector<8x1xf32>
      %300 = vector.broadcast %297 : vector<8x1xf32> to vector<8x8xf32>
      %301 = arith.subf %292, %300 : vector<8x8xf32>
      %302 = math.exp %301 : vector<8x8xf32>
      %c3_201 = arith.constant 3 : index
      %c0_202 = arith.constant 0 : index
      %c0_203 = arith.constant 0 : index
      %303 = vector.load %arg26[%c3_201, %c0_202, %c0_203] : memref<4x8x1xf32, #tpu.memory_space<vmem>>, vector<1x8x1xf32>
      %304 = vector.shape_cast %303 : vector<1x8x1xf32> to vector<8x1xf32>
      %305 = arith.mulf %299, %304 : vector<8x1xf32>
      %cst_204 = arith.constant dense<0.000000e+00> : vector<8xf32>
      %306 = vector.multi_reduction <add>, %302, %cst_204 [1] : vector<8x8xf32> to vector<8xf32>
      %307 = vector.shape_cast %306 : vector<8xf32> to vector<8x1xf32>
      %308 = arith.addf %305, %307 : vector<8x1xf32>
      %c3_205 = arith.constant 3 : index
      %c0_206 = arith.constant 0 : index
      %c0_207 = arith.constant 0 : index
      %309 = vector.load %arg26[%c3_205, %c0_206, %c0_207] : memref<4x8x1xf32, #tpu.memory_space<vmem>>, vector<1x8x1xf32>
      %310 = vector.shape_cast %309 : vector<1x8x1xf32> to vector<8x1xf32>
      %311 = vector.shape_cast %308 : vector<8x1xf32> to vector<1x8x1xf32>
      tpu.vector_store %arg26[%c3_205, %c0_206, %c0_207], %311 {strides = array<i32>} : memref<4x8x1xf32, #tpu.memory_space<vmem>>, vector<1x8x1xf32>,
      %c3_208 = arith.constant 3 : index
      %c0_209 = arith.constant 0 : index
      %c0_210 = arith.constant 0 : index
      %312 = vector.load %arg27[%c3_208, %c0_209, %c0_210] : memref<4x8x8xf32, #tpu.memory_space<vmem>>, vector<1x8x8xf32>
      %313 = vector.shape_cast %312 : vector<1x8x8xf32> to vector<8x8xf32>
      %314 = vector.broadcast %299 : vector<8x1xf32> to vector<8x8xf32>
      %315 = arith.mulf %314, %313 : vector<8x8xf32>
      %316 = arith.truncf %302 : vector<8x8xf32> to vector<8x8xbf16>
      %cst_211 = arith.constant dense<0.000000e+00> : vector<8x8xf32>
      %317 = tpu.matmul %316, %287, %cst_211 {dimension_numbers = #tpu.dot_dimension_numbers<[1], [0], [0], [1], [0, 0, 1, 1], [], []>} : vector<8x8xbf16>, vector<8x8xbf16>, vector<8x8xf32> -> vector<8x8xf32>
      %318 = arith.addf %315, %317 : vector<8x8xf32>
      %c3_212 = arith.constant 3 : index
      %c0_213 = arith.constant 0 : index
      %c0_214 = arith.constant 0 : index
      %319 = vector.load %arg27[%c3_212, %c0_213, %c0_214] : memref<4x8x8xf32, #tpu.memory_space<vmem>>, vector<1x8x8xf32>
      %320 = vector.shape_cast %319 : vector<1x8x8xf32> to vector<8x8xf32>
      %321 = vector.shape_cast %318 : vector<8x8xf32> to vector<1x8x8xf32>
      tpu.vector_store %arg27[%c3_212, %c0_213, %c0_214], %321 {strides = array<i32>} : memref<4x8x8xf32, #tpu.memory_space<vmem>>, vector<1x8x8xf32>,
      %c3_215 = arith.constant 3 : index
      %c0_216 = arith.constant 0 : index
      %c0_217 = arith.constant 0 : index
      %322 = vector.load %arg25[%c3_215, %c0_216, %c0_217] : memref<4x8x1xf32, #tpu.memory_space<vmem>>, vector<1x8x1xf32>
      %323 = vector.shape_cast %322 : vector<1x8x1xf32> to vector<8x1xf32>
      %324 = vector.shape_cast %297 : vector<8x1xf32> to vector<1x8x1xf32>
      tpu.vector_store %arg25[%c3_215, %c0_216, %c0_217], %324 {strides = array<i32>} : memref<4x8x1xf32, #tpu.memory_space<vmem>>, vector<1x8x1xf32>,
    }
    %c0_39 = arith.constant 0 : index
    %c0_40 = arith.constant 0 : index
    %c0_41 = arith.constant 0 : index
    %48 = vector.load %arg27[%c0_39, %c0_40, %c0_41] : memref<4x8x8xf32, #tpu.memory_space<vmem>>, vector<1x8x8xf32>
    %49 = vector.shape_cast %48 : vector<1x8x8xf32> to vector<8x8xf32>
    %c0_42 = arith.constant 0 : index
    %c0_43 = arith.constant 0 : index
    %c0_44 = arith.constant 0 : index
    %50 = vector.load %arg26[%c0_42, %c0_43, %c0_44] : memref<4x8x1xf32, #tpu.memory_space<vmem>>, vector<1x8x1xf32>
    %51 = vector.shape_cast %50 : vector<1x8x1xf32> to vector<8x1xf32>
    %52 = tpu.reciprocal %51 {approx = true} : vector<8x1xf32> -> vector<8x1xf32>
    %53 = vector.broadcast %52 : vector<8x1xf32> to vector<8x8xf32>
    %54 = arith.mulf %49, %53 : vector<8x8xf32>
    %c1_45 = arith.constant 1 : index
    %c0_46 = arith.constant 0 : index
    %c0_47 = arith.constant 0 : index
    %55 = vector.load %arg27[%c1_45, %c0_46, %c0_47] : memref<4x8x8xf32, #tpu.memory_space<vmem>>, vector<1x8x8xf32>
    %56 = vector.shape_cast %55 : vector<1x8x8xf32> to vector<8x8xf32>
    %c1_48 = arith.constant 1 : index
    %c0_49 = arith.constant 0 : index
    %c0_50 = arith.constant 0 : index
    %57 = vector.load %arg26[%c1_48, %c0_49, %c0_50] : memref<4x8x1xf32, #tpu.memory_space<vmem>>, vector<1x8x1xf32>
    %58 = vector.shape_cast %57 : vector<1x8x1xf32> to vector<8x1xf32>
    %59 = tpu.reciprocal %58 {approx = true} : vector<8x1xf32> -> vector<8x1xf32>
    %60 = vector.broadcast %59 : vector<8x1xf32> to vector<8x8xf32>
    %61 = arith.mulf %56, %60 : vector<8x8xf32>
    %c2_51 = arith.constant 2 : index
    %c0_52 = arith.constant 0 : index
    %c0_53 = arith.constant 0 : index
    %62 = vector.load %arg27[%c2_51, %c0_52, %c0_53] : memref<4x8x8xf32, #tpu.memory_space<vmem>>, vector<1x8x8xf32>
    %63 = vector.shape_cast %62 : vector<1x8x8xf32> to vector<8x8xf32>
    %c2_54 = arith.constant 2 : index
    %c0_55 = arith.constant 0 : index
    %c0_56 = arith.constant 0 : index
    %64 = vector.load %arg26[%c2_54, %c0_55, %c0_56] : memref<4x8x1xf32, #tpu.memory_space<vmem>>, vector<1x8x1xf32>
    %65 = vector.shape_cast %64 : vector<1x8x1xf32> to vector<8x1xf32>
    %66 = tpu.reciprocal %65 {approx = true} : vector<8x1xf32> -> vector<8x1xf32>
    %67 = vector.broadcast %66 : vector<8x1xf32> to vector<8x8xf32>
    %68 = arith.mulf %63, %67 : vector<8x8xf32>
    %c3_57 = arith.constant 3 : index
    %c0_58 = arith.constant 0 : index
    %c0_59 = arith.constant 0 : index
    %69 = vector.load %arg27[%c3_57, %c0_58, %c0_59] : memref<4x8x8xf32, #tpu.memory_space<vmem>>, vector<1x8x8xf32>
    %70 = vector.shape_cast %69 : vector<1x8x8xf32> to vector<8x8xf32>
    %c3_60 = arith.constant 3 : index
    %c0_61 = arith.constant 0 : index
    %c0_62 = arith.constant 0 : index
    %71 = vector.load %arg26[%c3_60, %c0_61, %c0_62] : memref<4x8x1xf32, #tpu.memory_space<vmem>>, vector<1x8x1xf32>
    %72 = vector.shape_cast %71 : vector<1x8x1xf32> to vector<8x1xf32>
    %73 = tpu.reciprocal %72 {approx = true} : vector<8x1xf32> -> vector<8x1xf32>
    %74 = vector.broadcast %73 : vector<8x1xf32> to vector<8x8xf32>
    %75 = arith.mulf %70, %74 : vector<8x8xf32>
    %76 = tpu.concatenate %54, %61, %68, %75 in 1 : vector<8x8xf32>, vector<8x8xf32>, vector<8x8xf32>, vector<8x8xf32> -> vector<8x32xf32>
    %77 = arith.truncf %76 : vector<8x32xf32> to vector<8x32xbf16>
    %c0_63 = arith.constant 0 : index
    %c0_64 = arith.constant 0 : index
    %78 = vector.load %arg12[%c0_63, %c0_64] : memref<32x32xbf16, #tpu.memory_space<vmem>>, vector<32x32xbf16>
    %cst_65 = arith.constant dense<0.000000e+00> : vector<8x32xf32>
    %79 = tpu.matmul %77, %78, %cst_65 {dimension_numbers = #tpu.dot_dimension_numbers<[1], [0], [0], [1], [0, 0, 1, 1], [], []>} : vector<8x32xbf16>, vector<32x32xbf16>, vector<8x32xf32> -> vector<8x32xf32>
    %c0_66 = arith.constant 0 : index
    %c0_67 = arith.constant 0 : index
    %80 = vector.load %arg13[%c0_66, %c0_67] : memref<1x32xf32, #tpu.memory_space<vmem>>, vector<1x32xf32>
    %81 = vector.broadcast %80 : vector<1x32xf32> to vector<8x32xf32>
    %82 = arith.addf %79, %81 : vector<8x32xf32>
    %c0_68 = arith.constant 0 : index
    %c0_69 = arith.constant 0 : index
    %c0_70 = arith.constant 0 : index
    %83 = vector.load %arg3[%c0_68, %c0_69, %c0_70] : memref<1x8x32xf32, #tpu.memory_space<vmem>>, vector<1x8x32xf32>
    %84 = vector.shape_cast %83 : vector<1x8x32xf32> to vector<8x32xf32>
    %85 = arith.addf %84, %82 : vector<8x32xf32>
    %c0_71 = arith.constant 0 : index
    %c0_72 = arith.constant 0 : index
    %86 = vector.load %arg14[%c0_71, %c0_72] : memref<1x32xf32, #tpu.memory_space<vmem>>, vector<1x32xf32>
    %c0_73 = arith.constant 0 : index
    %c0_74 = arith.constant 0 : index
    %87 = vector.load %arg15[%c0_73, %c0_74] : memref<1x32xf32, #tpu.memory_space<vmem>>, vector<1x32xf32>
    %cst_75 = arith.constant dense<0.000000e+00> : vector<8xf32>
    %88 = vector.multi_reduction <add>, %85, %cst_75 [1] : vector<8x32xf32> to vector<8xf32>
    %89 = vector.shape_cast %88 : vector<8xf32> to vector<8x1xf32>
    %cst_76 = arith.constant 3.200000e+01 : f32
    %90 = vector.broadcast %cst_76 : f32 to vector<8x1xf32>
    %91 = arith.divf %89, %90 : vector<8x1xf32>
    %92 = vector.broadcast %91 : vector<8x1xf32> to vector<8x32xf32>
    %93 = arith.subf %85, %92 : vector<8x32xf32>
    %94 = arith.mulf %93, %93 : vector<8x32xf32>
    %cst_77 = arith.constant dense<0.000000e+00> : vector<8xf32>
    %95 = vector.multi_reduction <add>, %94, %cst_77 [1] : vector<8x32xf32> to vector<8xf32>
    %96 = vector.shape_cast %95 : vector<8xf32> to vector<8x1xf32>
    %cst_78 = arith.constant 3.200000e+01 : f32
    %97 = vector.broadcast %cst_78 : f32 to vector<8x1xf32>
    %98 = arith.divf %96, %97 : vector<8x1xf32>
    %cst_79 = arith.constant 9.99999974E-6 : f32
    %99 = vector.broadcast %cst_79 : f32 to vector<8x1xf32>
    %100 = arith.addf %98, %99 : vector<8x1xf32>
    %101 = math.rsqrt %100 : vector<8x1xf32>
    %102 = vector.broadcast %101 : vector<8x1xf32> to vector<8x32xf32>
    %103 = arith.mulf %93, %102 : vector<8x32xf32>
    %104 = vector.broadcast %86 : vector<1x32xf32> to vector<8x32xf32>
    %105 = arith.mulf %104, %103 : vector<8x32xf32>
    %106 = vector.broadcast %87 : vector<1x32xf32> to vector<8x32xf32>
    %107 = arith.addf %105, %106 : vector<8x32xf32>
    %108 = arith.truncf %107 : vector<8x32xf32> to vector<8x32xbf16>
    %c0_80 = arith.constant 0 : index
    %c0_81 = arith.constant 0 : index
    %109 = vector.load %arg16[%c0_80, %c0_81] : memref<32x128xbf16, #tpu.memory_space<vmem>>, vector<32x128xbf16>
    %cst_82 = arith.constant dense<0.000000e+00> : vector<8x128xf32>
    %110 = tpu.matmul %108, %109, %cst_82 {dimension_numbers = #tpu.dot_dimension_numbers<[1], [0], [0], [1], [0, 0, 1, 1], [], []>} : vector<8x32xbf16>, vector<32x128xbf16>, vector<8x128xf32> -> vector<8x128xf32>
    %c0_83 = arith.constant 0 : index
    %c0_84 = arith.constant 0 : index
    %111 = vector.load %arg17[%c0_83, %c0_84] : memref<1x128xf32, #tpu.memory_space<vmem>>, vector<1x128xf32>
    %112 = vector.broadcast %111 : vector<1x128xf32> to vector<8x128xf32>
    %113 = arith.addf %110, %112 : vector<8x128xf32>
    %cst_85 = arith.constant 0.636619746 : f32
    %114 = math.sqrt %cst_85 : f32
    %cst_86 = arith.constant 5.000000e-01 : f32
    %115 = vector.broadcast %cst_86 : f32 to vector<8x128xf32>
    %116 = arith.mulf %115, %113 : vector<8x128xf32>
    %117 = arith.mulf %113, %113 : vector<8x128xf32>
    %118 = arith.mulf %117, %113 : vector<8x128xf32>
    %cst_87 = arith.constant 4.471500e-02 : f32
    %119 = vector.broadcast %cst_87 : f32 to vector<8x128xf32>
    %120 = arith.mulf %119, %118 : vector<8x128xf32>
    %121 = arith.addf %113, %120 : vector<8x128xf32>
    %122 = vector.broadcast %114 : f32 to vector<8x128xf32>
    %123 = arith.mulf %122, %121 : vector<8x128xf32>
    %124 = math.tanh %123 : vector<8x128xf32>
    %cst_88 = arith.constant 1.000000e+00 : f32
    %125 = vector.broadcast %cst_88 : f32 to vector<8x128xf32>
    %126 = arith.addf %125, %124 : vector<8x128xf32>
    %127 = arith.mulf %116, %126 : vector<8x128xf32>
    %128 = arith.truncf %127 : vector<8x128xf32> to vector<8x128xbf16>
    %c0_89 = arith.constant 0 : index
    %c0_90 = arith.constant 0 : index
    %129 = vector.load %arg18[%c0_89, %c0_90] : memref<128x32xbf16, #tpu.memory_space<vmem>>, vector<128x32xbf16>
    %cst_91 = arith.constant dense<0.000000e+00> : vector<8x32xf32>
    %130 = tpu.matmul %128, %129, %cst_91 {dimension_numbers = #tpu.dot_dimension_numbers<[1], [0], [0], [1], [0, 0, 1, 1], [], []>} : vector<8x128xbf16>, vector<128x32xbf16>, vector<8x32xf32> -> vector<8x32xf32>
    %c0_92 = arith.constant 0 : index
    %c0_93 = arith.constant 0 : index
    %131 = vector.load %arg19[%c0_92, %c0_93] : memref<1x32xf32, #tpu.memory_space<vmem>>, vector<1x32xf32>
    %132 = vector.broadcast %131 : vector<1x32xf32> to vector<8x32xf32>
    %133 = arith.addf %130, %132 : vector<8x32xf32>
    %134 = arith.addf %85, %133 : vector<8x32xf32>
    %c0_94 = arith.constant 0 : index
    %c0_95 = arith.constant 0 : index
    %c0_96 = arith.constant 0 : index
    %135 = vector.load %arg20[%c0_94, %c0_95, %c0_96] : memref<1x8x32xf32, #tpu.memory_space<vmem>>, vector<1x8x32xf32>
    %136 = vector.shape_cast %135 : vector<1x8x32xf32> to vector<8x32xf32>
    %137 = vector.shape_cast %134 : vector<8x32xf32> to vector<1x8x32xf32>
    tpu.vector_store %arg20[%c0_94, %c0_95, %c0_96], %137 {strides = array<i32>} : memref<1x8x32xf32, #tpu.memory_space<vmem>>, vector<1x8x32xf32>,
    return
  }
  func.func @transform_0(%arg0: i32, %arg1: i32) -> (i32, i32, i32) {
    %c0_i32 = arith.constant 0 : i32
    %c0_i32_0 = arith.constant 0 : i32
    %c0_i32_1 = arith.constant 0 : i32
    return %arg0, %c0_i32, %c0_i32_0 : i32, i32, i32
  }
  func.func @transform_1(%arg0: i32, %arg1: i32) -> (i32, i32, i32) {
    %c0_i32 = arith.constant 0 : i32
    %c0_i32_0 = arith.constant 0 : i32
    return %arg0, %arg1, %c0_i32 : i32, i32, i32
  }
  func.func @transform_2(%arg0: i32, %arg1: i32) -> (i32, i32) {
    %c0_i32 = arith.constant 0 : i32
    %c0_i32_0 = arith.constant 0 : i32
    %c0_i32_1 = arith.constant 0 : i32
    return %c0_i32, %c0_i32_0 : i32, i32
  }
  func.func @transform_3(%arg0: i32, %arg1: i32) -> (i32, i32) {
    %c0_i32 = arith.constant 0 : i32
    %c0_i32_0 = arith.constant 0 : i32
    %c0_i32_1 = arith.constant 0 : i32
    return %c0_i32, %c0_i32_0 : i32, i32
  }
  func.func @transform_4(%arg0: i32, %arg1: i32) -> (i32, i32) {
    %c0_i32 = arith.constant 0 : i32
    %c0_i32_0 = arith.constant 0 : i32
    %c0_i32_1 = arith.constant 0 : i32
    return %c0_i32, %c0_i32_0 : i32, i32
  }
  func.func @transform_5(%arg0: i32, %arg1: i32) -> (i32, i32) {
    %c0_i32 = arith.constant 0 : i32
    %c0_i32_0 = arith.constant 0 : i32
    %c0_i32_1 = arith.constant 0 : i32
    return %c0_i32, %c0_i32_0 : i32, i32
  }
  func.func @transform_6(%arg0: i32, %arg1: i32) -> (i32, i32) {
    %c0_i32 = arith.constant 0 : i32
    %c0_i32_0 = arith.constant 0 : i32
    %c0_i32_1 = arith.constant 0 : i32
    return %c0_i32, %c0_i32_0 : i32, i32
  }
  func.func @transform_7(%arg0: i32, %arg1: i32) -> (i32, i32) {
    %c0_i32 = arith.constant 0 : i32
    %c0_i32_0 = arith.constant 0 : i32
    %c0_i32_1 = arith.constant 0 : i32
    return %c0_i32, %c0_i32_0 : i32, i32
  }
  func.func @transform_8(%arg0: i32, %arg1: i32) -> (i32, i32) {
    %c0_i32 = arith.constant 0 : i32
    %c0_i32_0 = arith.constant 0 : i32
    %c0_i32_1 = arith.constant 0 : i32
    return %c0_i32, %c0_i32_0 : i32, i32
  }
  func.func @transform_9(%arg0: i32, %arg1: i32) -> (i32, i32) {
    %c0_i32 = arith.constant 0 : i32
    %c0_i32_0 = arith.constant 0 : i32
    %c0_i32_1 = arith.constant 0 : i32
    return %c0_i32, %c0_i32_0 : i32, i32
  }
  func.func @transform_10(%arg0: i32, %arg1: i32) -> (i32, i32) {
    %c0_i32 = arith.constant 0 : i32
    %c0_i32_0 = arith.constant 0 : i32
    %c0_i32_1 = arith.constant 0 : i32
    return %c0_i32, %c0_i32_0 : i32, i32
  }
  func.func @transform_11(%arg0: i32, %arg1: i32) -> (i32, i32) {
    %c0_i32 = arith.constant 0 : i32
    %c0_i32_0 = arith.constant 0 : i32
    %c0_i32_1 = arith.constant 0 : i32
    return %c0_i32, %c0_i32_0 : i32, i32
  }
  func.func @transform_12(%arg0: i32, %arg1: i32) -> (i32, i32) {
    %c0_i32 = arith.constant 0 : i32
    %c0_i32_0 = arith.constant 0 : i32
    %c0_i32_1 = arith.constant 0 : i32
    return %c0_i32, %c0_i32_0 : i32, i32
  }
  func.func @transform_13(%arg0: i32, %arg1: i32) -> (i32, i32) {
    %c0_i32 = arith.constant 0 : i32
    %c0_i32_0 = arith.constant 0 : i32
    %c0_i32_1 = arith.constant 0 : i32
    return %c0_i32, %c0_i32_0 : i32, i32
  }
  func.func @transform_14(%arg0: i32, %arg1: i32) -> (i32, i32) {
    %c0_i32 = arith.constant 0 : i32
    %c0_i32_0 = arith.constant 0 : i32
    %c0_i32_1 = arith.constant 0 : i32
    return %c0_i32, %c0_i32_0 : i32, i32
  }
  func.func @transform_15(%arg0: i32, %arg1: i32) -> (i32, i32) {
    %c0_i32 = arith.constant 0 : i32
    %c0_i32_0 = arith.constant 0 : i32
    %c0_i32_1 = arith.constant 0 : i32
    return %c0_i32, %c0_i32_0 : i32, i32
  }
  func.func @transform_16(%arg0: i32, %arg1: i32) -> (i32, i32) {
    %c0_i32 = arith.constant 0 : i32
    %c0_i32_0 = arith.constant 0 : i32
    %c0_i32_1 = arith.constant 0 : i32
    return %c0_i32, %c0_i32_0 : i32, i32
  }
  func.func @transform_17(%arg0: i32, %arg1: i32) -> (i32, i32) {
    %c0_i32 = arith.constant 0 : i32
    %c0_i32_0 = arith.constant 0 : i32
    %c0_i32_1 = arith.constant 0 : i32
    return %c0_i32, %c0_i32_0 : i32, i32
  }
  func.func @transform_18(%arg0: i32, %arg1: i32) -> (i32, i32, i32) {
    %c0_i32 = arith.constant 0 : i32
    %c0_i32_0 = arith.constant 0 : i32
    return %arg0, %arg1, %c0_i32 : i32, i32, i32
  }
}

</mosaic_0001>

<bundles_post_ra>
// kernel: tpu_custom_call.1
= control target key start
LH: loop header
LB: loop body
LE: loop exit
PB: predicated region body
PF: predicated region fallthrough
CT: control target
= control target key end

     0   :  { %s3567_s0 = inlined_call_operand.vmem [shape: f32[2,8,32], index: 0, kind: input, shape index: {}]   ;;  %s3568_s1 = inlined_call_operand.vmem [shape: f32[2,8,32], index: 1, kind: input, shape index: {}]   ;;  %s3569_s2 = inlined_call_operand.vmem [shape: f32[1,32], index: 2, kind: input, shape index: {}]   ;;  %s3570_s3 = inlined_call_operand.hbm [shape: f32[1,32], index: 3, kind: input, shape index: {}]   ;;  %s3571_s4 = inlined_call_operand.vmem [shape: bf16[32,32], index: 4, kind: input, shape index: {}]   ;;  %s3572_s5 = inlined_call_operand.hbm [shape: f32[1,32], index: 5, kind: input, shape index: {}]   ;;  %s3573_s6 = inlined_call_operand.vmem [shape: bf16[32,32], index: 6, kind: input, shape index: {}]   ;;  %s3574_s7 = inlined_call_operand.hbm [shape: f32[1,32], index: 7, kind: input, shape index: {}]   ;;  %s3575_s8 = inlined_call_operand.vmem [shape: bf16[32,32], index: 8, kind: input, shape index: {}]   ;;  %s3576_s9 = inlined_call_operand.hbm [shape: f32[1,32], index: 9, kind: input, shape index: {}]   ;;  %s3577_s10 = inlined_call_operand.vmem [shape: bf16[32,32], index: 10, kind: input, shape index: {}]   ;;  %s3578_s11 = inlined_call_operand.hbm [shape: f32[1,32], index: 11, kind: input, shape index: {}]   ;;  %s3579_s12 = inlined_call_operand.hbm [shape: f32[1,32], index: 12, kind: input, shape index: {}]   ;;  %s3580_s13 = inlined_call_operand.hbm [shape: f32[1,32], index: 13, kind: input, shape index: {}]   ;;  %s3581_s14 = inlined_call_operand.vmem [shape: bf16[32,128], index: 14, kind: input, shape index: {}]   ;;  %s3582_s15 = inlined_call_operand.vmem [shape: f32[1,128], index: 15, kind: input, shape index: {}]   ;;  %s3583_s16 = inlined_call_operand.vmem [shape: bf16[128,32], index: 16, kind: input, shape index: {}]   ;;  %s3584_s17 = inlined_call_operand.vmem [shape: f32[1,32], index: 17, kind: input, shape index: {}]   ;;  %s3585_s18 = inlined_call_operand.hbm [shape: f32[2,8,32], index: 18, kind: output, shape index: {}]  }
   0x1   :  { %3600 = sst [smem:[#allocation35_spill]] %s3567_s0 }
   0x2   :  { %3601 = sst [smem:[#allocation36_spill]] %s3568_s1 }
   0x3   :  { %3602 = sst [smem:[#allocation37_spill]] %s3569_s2 }
   0x4   :  { %3603 = sst [smem:[#allocation38_spill]] %s3582_s15 }
   0x5   :  { %3604 = sst [smem:[#allocation39_spill]] %s3584_s17 }
   0x6   :  { %3605 = sst [smem:[#allocation40_spill]] %s3585_s18 }
   0x7   :  { %23 = vsyncpa [#allocation10], 0 }
   0x8   :  { %24 = vsyncpa [#allocation13], 0 }
   0x9   :  { %25 = vsyncpa [#allocation16], 0 }
   0xa   :  { %26 = vsyncpa [#allocation19], 0 }
   0xb   :  { %27 = vsyncpa [#allocation11], 0 }
   0xc   :  { %29 = vsyncpa [#allocation11 + $0x1], 0  ;;  %s2986_s27 = smov 0   ;;  %s2988_s28 = smov 0  }
   0xd   :  { %s2990_s29 = smov 0   ;;  %s2992_s30 = smov 0  }
   0xe   :  { %s2994_s0 = smov 0   ;;  %s2996_s19 = smov 0  }
   0xf LB: > { %3606 = sst [smem:[#allocation27_spill]] %s2844_s27  ;;  %s2135_s1 = sadd.s32 4294967295, %s2864_s19   ;;  %s2864_s19 = sphi %s2996_s19, %s35_s19   ;;  %s2860_s0 = sphi %s2994_s0, %s3637_s0   ;;  %s2856_s30 = sphi %s2992_s30, %s3636_s30   ;;  %s2852_s29 = sphi %s2990_s29, %s3635_s29   ;;  %s2848_s28 = sphi %s2988_s28, %s3639_s28   ;;  %s2844_s27 = sphi %s2986_s27, %s3638_s27  }
  0x10   : > { %3607 = sst [smem:[#allocation28_spill]] %s2852_s29  ;;  %s2136_s20 = sadd.s32 4294967294, %s2864_s19  }
  0x11   : > { %3608 = sst [smem:[#allocation29_spill]] %s2860_s0  ;;  %s47_s21 = sadd.s32 1, %s2860_s0 }
  0x12   : > { %3609 = sst [smem:[#allocation30_spill]] %s2864_s19  ;;  %s446_s22 = sadd.s32 1, %s2852_s29 }
  0x13   : > { %p49_p0 = scmp.ge.s32.totalorder %s47_s21, 2  ;;  %p456_p1 = scmp.ne.s32.totalorder %s2852_s29, %s2848_s28 }
  0x14   : > { %p457_p2 = scmp.eq.s32.totalorder %s2135_s1, 1  ;;  %p462_p3 = scmp.ne.s32.totalorder %s2848_s28, %s2844_s27 }
  0x15   : > { %s3641_s21 = smov (%p49_p0, %s47_s21), 0  ;;  %p463_p5 = scmp.eq.s32.totalorder %s2136_s20, 1 }
  0x16   : > { %3610 = sst [smem:[#allocation31_spill]] %s3641_s21  ;;  %p3026_p4 = por %p457_p2, %p456_p1 }
  0x17   : > { %s441_s23 = ssub.s32 %s2860_s0, %s3641_s21  ;;  %p2137_p6 = scmp.ge.s32.totalorder %s2864_s19, 1 }
  0x18   : > { %s3611_s2 = scalar_select %p3026_p4, 1, 0 }
  0x19   : > { %p444_p7 = scmp.eq.s32.totalorder %s441_s23, 0  ;;  %p3033_p8 = por %p463_p5, %p462_p3 }
  0x1a   : > { %3612 = sst [smem:[#allocation32_spill]] %s3611_s2  ;;  %p470_p9 = scmp.lt.s32.totalorder %s2864_s19, 3 }
  0x1b   : > { %s3613_s24 = scalar_select %p3033_p8, 1, 0 }
  0x1c   : > { %s3039_s25 = scalar_select %p444_p7, %s2852_s29, %s446_s22  }
  0x1d   : > { %3614 = sst [smem:[#allocation33_spill]] %s3613_s24  ;;  %p3041_p10 = pnand %p2137_p6, %p470_p9 }
  0x1e   : > { %3615 = sst [smem:[#allocation34_spill]] %s3039_s25  ;;  %p3045_p11 = scmp.eq.s32.totalorder %s2135_s1, 0 }
  0x1f   : > { %s3616_s26 = scalar_select %p3041_p10, 1, 0 }
  0x20   : > { %s3617_s27 = scalar_select %p3045_p11, 1, 0 }
  0x21   : > { %p2401_p12 = pneg %p3041_p10  ;;  %s2870_s20 = smov [#allocation12]  }
  0x22   : > { %s500_s23 = sshll.u32 %s2870_s20, 4  ;;  %s2871_s21 = smov [#allocation15]   ;;  %s501_s23 = int_to_ptr.vmem [resolvable:$true] %s500_s23 }
  0x23   : > { %s528_s0 = sshll.u32 %s2871_s21, 4  ;;  %p3053_p13 = pnand %p3045_p11, %p2401_p12  ;;  %s3057_s0 = int_to_ptr.vmem [resolvable:$true] %s528_s0 }
  0x24   : > { %s2872_s1 = smov [#allocation18]   ;;  %s2570_s19 = scalar_lea.hbm %s3572_s5, 16 }
  0x25   : > { %s3059_s25 = sshll.u32 %s2872_s1, 4  ;;  %p2571_p0 = scmp.ne.s32.totalorder %s3572_s5, %s2570_s19  ;;  %s554_s25 = int_to_ptr.vmem [resolvable:$true] %s3059_s25 }
  0x26   : > { %p3069_p1 = pneg %p3053_p13  ;;  %p2577_p5 = scmp.lt.u32.totalorder %s2570_s19, %s3572_s5 }
  0x28   : > { %p2573_p2 = pnand %p3069_p1, %p2571_p0 }
  0x2a   : > { %p2574_p3 = pneg %p2573_p2 }
  0x2c   : > { %p2579_p6 = pnand %p2577_p5, %p2574_p3 }
  0x2e   : > { %2582 = shalt.err (!%p2579_p6)
}
  0x2f   : > { %s2583_s29 = scalar_lea.vmem %s501_s23, 16  ;;  %s2590_s18 = scalar_lea.vmem %s501_s23, 32 }
  0x30   : > { %p2584_p7 = scmp.ne.s32.totalorder %s501_s23, %s2583_s29  ;;  %p2591_p8 = scmp.lt.s32.totalorder %s501_s23, %s501_s23 }
  0x31   : > { %p2592_p4 = scmp.lt.s32.totalorder %s2590_s18, %s2583_s29 }
  0x32   : > { %p2586_p9 = pnand %p2584_p7, %p3069_p1 }
  0x33   : > { %p2593_p11 = por %p2592_p4, %p2591_p8 }
  0x34   : > { %p2587_p12 = pneg %p2586_p9 }
  0x36   : > { %p2594_p10 = pnand %p2593_p11, %p2587_p12 }
  0x38   : > { %2597 = shalt.err (!%p2594_p10)
}
  0x39   : > { %2407 = dma.hbm_to_vmem [thread:$0]  (!%p3053_p13), %s3572_s5, 16, %s501_s23, [#allocation13]  }
  0x3a   : > { %s2598_s1 = scalar_lea.hbm %s3576_s9, 16 }
  0x3b   : > { %p2599_p0 = scmp.ne.s32.totalorder %s3576_s9, %s2598_s1  ;;  %p2605_p8 = scmp.lt.u32.totalorder %s2598_s1, %s3576_s9 }
  0x3d   : > { %p2601_p2 = pnand %p2599_p0, %p3069_p1 }
  0x3f   : > { %p2602_p4 = pneg %p2601_p2 }
  0x41   : > { %p2607_p10 = pnand %p2605_p8, %p2602_p4 }
  0x43   : > { %2610 = shalt.err (!%p2607_p10)
}
  0x44   : > { %s2611_s23 = scalar_lea.vmem %s3057_s0, 16  ;;  %s2618_s15 = scalar_lea.vmem %s3057_s0, 32 }
  0x45   : > { %p2612_p11 = scmp.ne.s32.totalorder %s3057_s0, %s2611_s23  ;;  %p2619_p6 = scmp.lt.s32.totalorder %s3057_s0, %s3057_s0 }
  0x46   : > { %p2620_p7 = scmp.lt.s32.totalorder %s2618_s15, %s2611_s23 }
  0x47   : > { %p2614_p3 = pnand %p2612_p11, %p3069_p1 }
  0x48   : > { %p2621_p9 = por %p2620_p7, %p2619_p6 }
  0x49   : > { %p2615_p5 = pneg %p2614_p3 }
  0x4b   : > { %p2622_p12 = pnand %p2621_p9, %p2615_p5 }
  0x4d   : > { %2625 = shalt.err (!%p2622_p12)
}
  0x4e   : > { %2413 = dma.hbm_to_vmem [thread:$0]  (!%p3053_p13), %s3576_s9, 16, %s3057_s0, [#allocation16]  }
  0x4f   : > { %s2626_s2 = scalar_lea.hbm %s3579_s12, 16 }
  0x50   : > { %p2627_p0 = scmp.ne.s32.totalorder %s3579_s12, %s2626_s2  ;;  %p2633_p8 = scmp.lt.u32.totalorder %s2626_s2, %s3579_s12 }
  0x52   : > { %p2629_p2 = pnand %p2627_p0, %p3069_p1 }
  0x54   : > { %p2630_p4 = pneg %p2629_p2 }
  0x56   : > { %p2635_p10 = pnand %p2633_p8, %p2630_p4 }
  0x58   : > { %2638 = shalt.err (!%p2635_p10)
}
  0x59   : > { %s2639_s15 = scalar_lea.vmem %s554_s25, 16  ;;  %s2646_s0 = scalar_lea.vmem %s554_s25, 32 }
  0x5a   : > { %p2640_p11 = scmp.ne.s32.totalorder %s554_s25, %s2639_s15  ;;  %p2647_p6 = scmp.lt.s32.totalorder %s554_s25, %s554_s25 }
  0x5b   : > { %p2648_p7 = scmp.lt.s32.totalorder %s2646_s0, %s2639_s15 }
  0x5c   : > { %p2642_p3 = pnand %p2640_p11, %p3069_p1 }
  0x5d   : > { %p2649_p9 = por %p2648_p7, %p2647_p6 }
  0x5e   : > { %p2643_p5 = pneg %p2642_p3 }
  0x60   : > { %p2650_p12 = pnand %p2649_p9, %p2643_p5 }
  0x62   : > { %2653 = shalt.err (!%p2650_p12)
}
  0x63   : > { %2419 = dma.hbm_to_vmem [thread:$0]  (!%p3053_p13), %s3579_s12, 16, %s554_s25, [#allocation19]  }
  0x64   : > { %s2873_s20 = smov [#allocation9]   ;;  %s2874_s2 = smov [#allocation14]  }
  0x65   : > { %s486_s19 = sshll.u32 %s2873_s20, 4  ;;  %s514_s1 = sshll.u32 %s2874_s2, 4  ;;  %s487_s19 = int_to_ptr.vmem [resolvable:$true] %s486_s19  ;;  %s3128_s1 = int_to_ptr.vmem [resolvable:$true] %s514_s1 }
  0x66   : > { %s2654_s23 = scalar_lea.hbm %s3570_s3, 16 }
  0x67   : > { %p2655_p0 = scmp.ne.s32.totalorder %s3570_s3, %s2654_s23  ;;  %p2661_p8 = scmp.lt.u32.totalorder %s2654_s23, %s3570_s3 }
  0x69   : > { %p2657_p2 = pnand %p2655_p0, %p3069_p1 }
  0x6b   : > { %p2658_p4 = pneg %p2657_p2 }
  0x6d   : > { %p2663_p10 = pnand %p2661_p8, %p2658_p4 }
  0x6f   : > { %2666 = shalt.err (!%p2663_p10)
}
  0x70   : > { %s2667_s24 = scalar_lea.vmem %s487_s19, 16  ;;  %s2674_s20 = scalar_lea.vmem %s487_s19, 32 }
  0x71   : > { %p2668_p11 = scmp.ne.s32.totalorder %s487_s19, %s2667_s24  ;;  %p2675_p6 = scmp.lt.s32.totalorder %s487_s19, %s487_s19 }
  0x72   : > { %p2676_p7 = scmp.lt.s32.totalorder %s2674_s20, %s2667_s24 }
  0x73   : > { %p2670_p3 = pnand %p2668_p11, %p3069_p1 }
  0x74   : > { %p2677_p9 = por %p2676_p7, %p2675_p6 }
  0x75   : > { %p2671_p5 = pneg %p2670_p3 }
  0x77   : > { %p2678_p12 = pnand %p2677_p9, %p2671_p5 }
  0x79   : > { %2681 = shalt.err (!%p2678_p12)
}
  0x7a   : > { %2404 = dma.hbm_to_vmem [thread:$0]  (!%p3053_p13), %s3570_s3, 16, %s487_s19, [#allocation10]  }
  0x7b   : > { %s2682_s15 = scalar_lea.hbm %s3574_s7, 16 }
  0x7c   : > { %p2683_p0 = scmp.ne.s32.totalorder %s3574_s7, %s2682_s15  ;;  %p2689_p8 = scmp.lt.u32.totalorder %s2682_s15, %s3574_s7 }
  0x7e   : > { %p2685_p2 = pnand %p2683_p0, %p3069_p1 }
  0x80   : > { %p2686_p4 = pneg %p2685_p2 }
  0x82   : > { %p2691_p10 = pnand %p2689_p8, %p2686_p4 }
  0x84   : > { %2694 = shalt.err (!%p2691_p10)
}
  0x85   : > { %s2695_s19 = scalar_lea.vmem %s3128_s1, 16  ;;  %s2702_s20 = scalar_lea.vmem %s3128_s1, 32 }
  0x86   : > { %p2696_p11 = scmp.ne.s32.totalorder %s3128_s1, %s2695_s19  ;;  %p2703_p6 = scmp.lt.s32.totalorder %s3128_s1, %s3128_s1 }
  0x87   : > { %p2704_p7 = scmp.lt.s32.totalorder %s2702_s20, %s2695_s19 }
  0x88   : > { %p2698_p3 = pnand %p2696_p11, %p3069_p1 }
  0x89   : > { %p2705_p9 = por %p2704_p7, %p2703_p6 }
  0x8a   : > { %p2699_p5 = pneg %p2698_p3 }
  0x8c   : > { %p2706_p12 = pnand %p2705_p9, %p2699_p5 }
  0x8e   : > { %2709 = shalt.err (!%p2706_p12)
}
  0x8f   : > { %2410 = dma.hbm_to_vmem [thread:$0]  (!%p3053_p13), %s3574_s7, 16, %s3128_s1, [#allocation13]  }
  0x90   : > { %s2875_s18 = smov [#allocation17]   ;;  %s2876_s15 = smov [#allocation20]  }
  0x91   : > { %s542_s23 = sshll.u32 %s2875_s18, 4  ;;  %s564_s0 = sshll.u32 %s2876_s15, 4  ;;  %s543_s23 = int_to_ptr.vmem [resolvable:$true] %s542_s23  ;;  %s3172_s0 = int_to_ptr.vmem [resolvable:$true] %s564_s0 }
  0x92   : > { %s2710_s24 = scalar_lea.hbm %s3578_s11, 16 }
  0x93   : > { %p2711_p0 = scmp.ne.s32.totalorder %s3578_s11, %s2710_s24  ;;  %p2717_p8 = scmp.lt.u32.totalorder %s2710_s24, %s3578_s11 }
  0x95   : > { %p2713_p2 = pnand %p2711_p0, %p3069_p1 }
  0x97   : > { %p2714_p4 = pneg %p2713_p2 }
  0x99   : > { %p2719_p10 = pnand %p2717_p8, %p2714_p4 }
  0x9b   : > { %2722 = shalt.err (!%p2719_p10)
}
  0x9c   : > { %s2723_s29 = scalar_lea.vmem %s543_s23, 16  ;;  %s2730_s18 = scalar_lea.vmem %s543_s23, 32 }
  0x9d   : > { %p2724_p11 = scmp.ne.s32.totalorder %s543_s23, %s2723_s29  ;;  %p2731_p6 = scmp.lt.s32.totalorder %s543_s23, %s543_s23 }
  0x9e   : > { %p2732_p7 = scmp.lt.s32.totalorder %s2730_s18, %s2723_s29 }
  0x9f   : > { %p2726_p3 = pnand %p2724_p11, %p3069_p1 }
  0xa0   : > { %p2733_p9 = por %p2732_p7, %p2731_p6 }
  0xa1   : > { %p2727_p5 = pneg %p2726_p3 }
  0xa3   : > { %p2734_p12 = pnand %p2733_p9, %p2727_p5 }
  0xa5   : > { %2737 = shalt.err (!%p2734_p12)
}
  0xa6   : > { %2416 = dma.hbm_to_vmem [thread:$0]  (!%p3053_p13), %s3578_s11, 16, %s543_s23, [#allocation16]  }
  0xa7   : > { %s2738_s19 = scalar_lea.hbm %s3580_s13, 16 }
  0xa8   : > { %p2739_p0 = scmp.ne.s32.totalorder %s3580_s13, %s2738_s19  ;;  %p2745_p8 = scmp.lt.u32.totalorder %s2738_s19, %s3580_s13 }
  0xaa   : > { %p2741_p2 = pnand %p2739_p0, %p3069_p1 }
  0xac   : > { %p2742_p4 = pneg %p2741_p2 }
  0xae   : > { %p2747_p10 = pnand %p2745_p8, %p2742_p4 }
  0xb0   : > { %2750 = shalt.err (!%p2747_p10)
}
  0xb1   : > { %s2751_s23 = scalar_lea.vmem %s3172_s0, 16  ;;  %s2758_s18 = scalar_lea.vmem %s3172_s0, 32 }
  0xb2   : > { %p2752_p11 = scmp.ne.s32.totalorder %s3172_s0, %s2751_s23  ;;  %p2759_p6 = scmp.lt.s32.totalorder %s3172_s0, %s3172_s0 }
  0xb3   : > { %p2760_p7 = scmp.lt.s32.totalorder %s2758_s18, %s2751_s23 }
  0xb4   : > { %p2754_p3 = pnand %p2752_p11, %p3069_p1 }
  0xb5   : > { %p2761_p9 = por %p2760_p7, %p2759_p6 }
  0xb6   : > { %p2755_p5 = pneg %p2754_p3 }
  0xb8   : > { %p2762_p12 = pnand %p2761_p9, %p2755_p5 }
  0xba   : > { %2765 = shalt.err (!%p2762_p12)
}
  0xbb   : > { %2422 = dma.hbm_to_vmem [thread:$0]  (!%p3053_p13), %s3580_s13, 16, %s3172_s0, [#allocation19]  }
  0xbc   : > { %p3620_p0 = scmp.ne.s32.totalorder %s3616_s26, 0 }
  0xbd   : > { %p3621_p1 = scmp.ne.s32.totalorder (!%p3620_p0), %s3617_s27, 0 }
  0xbe   : > { %606 = sbr.rel (%p3620_p0) target bundleno = 3348 (0xd14), region = 92 }
  0xc5   : > { %2823 = dma.done.wait (%p3621_p1), [#allocation10], 16  }
  0xc6   : > { %2825 = vsyncadd (%p3621_p1), [#allocation10], 4294967280 }
  0xc7   : > { %2827 = dma.done.wait (%p3621_p1), [#allocation13], 32  }
  0xc8   : > { %2829 = vsyncadd (%p3621_p1), [#allocation13], 4294967264 }
  0xc9   : > { %2831 = dma.done.wait (%p3621_p1), [#allocation16], 32  }
  0xca   : > { %2833 = vsyncadd (%p3621_p1), [#allocation16], 4294967264 }
  0xcb   : > { %2835 = dma.done.wait (%p3621_p1), [#allocation19], 32  }
  0xcc   : > { %2837 = vsyncadd (%p3621_p1), [#allocation19], 4294967264  ;;  %p690_p13 = scmp.lt.s32.totalorder %s2856_s30, 1  ;;  %s3622_s25 = sld [smem:[#allocation35_spill]]  ;;  %vm710_vm0 = vcmask 261120   ;;  %vm1005_vm1 = vcmask 7168   ;;  %v1019_v47 = vlaneseq }
  0xcd   : > { %s3623_s2 = sld [smem:[#allocation36_spill]]  ;;  %s687_s27 = sand.u32 1, %s2848_s28   ;;  %vm1014_vm2 = vcmask 64512   ;;  %v2518_v7 = vld [vmem:[%s3573_s6] sm:$0xff]   ;;  %v2877_v8 = vmov 0.0   ;;  %v2878_v9 = vmov -inf  }
  0xce   : > { %s691_s26 = scalar_select %p690_p13, %s2856_s30, 1  ;;  %2263 = vmatprep.subr.bf16.mxu0 %v2877_v8  ;;  %1006 = vst.msk [vmem:[#allocation6] sm:$0xff] %vm1005_vm1, %v2878_v9  ;;  %1007 = vst.msk [vmem:[#allocation6 + $0x8] sm:$0xff] %vm1005_vm1, %v2878_v9  ;;  %2271 = vmatprep.subr.bf16.mxu1 %v2877_v8  ;;  %v2519_v10 = vld [vmem:[%s3575_s8] sm:$0xff]   ;;  %v2520_v11 = vld [vmem:[%s3573_s6 + $0x8] sm:$0xff]   ;;  %vm2879_vm3 = vmmov 0  }
  0xcf   : > { %s3252_s18 = sshll.u32 %s687_s27, 3  ;;  %1008 = vst.msk [vmem:[#allocation6 + $0x10] sm:$0xff] %vm1005_vm1, %v2878_v9  ;;  %1009 = vst.msk [vmem:[#allocation6 + $0x18] sm:$0xff] %vm1005_vm1, %v2878_v9  ;;  %2264 = vmatpush3.bf16.msra.mxu0 %v2518_v7  ;;  %2267 = vmatprep.mubr.msk.bf16.mxu0 %vm2879_vm3, %v2877_v8  ;;  %v2521_v12 = vld [vmem:[%s3575_s8 + $0x8] sm:$0xff]   ;;  %s3624_s19 = sld [smem:[#allocation37_spill]]  ;;  %vm740_vm4 = vcmask 257024  }
  0xd0   : > { %s2155_s22 = sshll.u32 %s691_s26, 3  ;;  %1010 = vst.msk [vmem:[#allocation7] sm:$0xff] %vm1005_vm1, %v2877_v8  ;;  %1011 = vst.msk [vmem:[#allocation7 + $0x8] sm:$0xff] %vm1005_vm1, %v2877_v8  ;;  %2272 = vmatpush3.bf16.msra.mxu1 %v2519_v10  ;;  %2265 = vmatprep.subr.bf16.mxu0 %v2877_v8  ;;  %v2158_v19 = vld [vmem:[#allocation9] ss:$0 sm:$0xff]  ;;  %v2522_v22 = vld [vmem:[%s3571_s4] sm:$0xff]  }
  0xd1   : > { %1012 = vst.msk [vmem:[#allocation7 + $0x10] sm:$0xff] %vm1005_vm1, %v2877_v8  ;;  %1013 = vst.msk [vmem:[#allocation7 + $0x18] sm:$0xff] %vm1005_vm1, %v2877_v8  ;;  %2273 = vmatprep.subr.bf16.mxu1 %v2877_v8  ;;  %2275 = vmatprep.mubr.msk.bf16.mxu1 %vm2879_vm3, %v2877_v8  ;;  %v2523_v24 = vld [vmem:[%s3571_s4 + $0x8] sm:$0xff]   ;;  %v2159_v26 = vld [vmem:[#allocation14] ss:$0 sm:$0xff]  ;;  %vm873_vm5 = vcmask 60416  }
  0xd2   : > { %s693_s24 = scalar_lea.vmem %s3622_s25, %s2155_s22  ;;  %1015 = vst.msk [vmem:[#allocation8] sm:$0xff] %vm1014_vm2, %v2877_v8  ;;  %1016 = vst.msk [vmem:[#allocation8 + $0x8] sm:$0xff] %vm1014_vm2, %v2877_v8  ;;  %v2163_v27 = vld [vmem:[#allocation15] ss:$0 sm:$0xff]  ;;  %s2880_s15 = smov 112   ;;  %v3310_v48 = vshrl.u32 %v1019_v47, 7 }
  0xd3   : > { %s3242_s1 = scalar_lea.vmem %s3623_s2, %s2155_s22  ;;  %v709_v0 = vld [vmem:[%s693_s24] sm:$0xff]  ;;  %1017 = vst.msk [vmem:[#allocation8 + $0x10] sm:$0xff] %vm1014_vm2, %v2877_v8  ;;  %1018 = vst.msk [vmem:[#allocation8 + $0x18] sm:$0xff] %vm1014_vm2, %v2877_v8  ;;  %2266 = vmatpush3.bf16.msra.mxu0 %v2520_v11  ;;  %s2881_s17 = smov 120   ;;  %v2169_v40 = vld [vmem:[#allocation12] ss:$0 sm:$0xff] }
  0xd4   : > { %v711_v1 = vsel %vm710_vm0, %v709_v0, 0.0  ;;  %2274 = vmatpush3.bf16.msra.mxu1 %v2521_v12  ;;  %2279 = vmatprep.subr.bf16.mxu0 %v2877_v8  ;;  %s2882_s26 = smov 104   ;;  %v3312_v49 = vand.u32 127, %v1019_v47  ;;  %s689_s22 = scalar_lea.vmem [#allocation21], %s3252_s18 }
  0xd5   : > { %712 = vadd.xlane.f32.xlu0 %v711_v1  ;;  %v2157_v17 = vld [vmem:[%s3624_s19] ss:$0 sm:$0xff]  ;;  %s3324_s21 = smov 0  }
 0x162   : > { %v713_v2 = vpop.xlane.xlu0 %712 }
 0x163   : > { %v715_v3 = vmul.f32 0.03125, %v713_v2 }
 0x165   : > { %v716_v4 = vsub.f32 %v709_v0, %v715_v3 }
 0x167   : > { %v717_v5 = vmul.f32 %v716_v4, %v716_v4 }
 0x169   : > { %v718_v6 = vsel %vm710_vm0, %v717_v5, 0.0 }
 0x16a   : > { %719 = vadd.xlane.f32.xlu0 %v718_v6 }
 0x1f7   : > { %v720_v13 = vpop.xlane.xlu0 %719 }
 0x1f8   : > { %v721_v14 = vmul.f32 0.03125, %v720_v13 }
 0x1fa   : > { %v722_v15 = vadd.f32 1e-05, %v721_v14 }
 0x1fc   : > { %2524 = vrsqrt.f32 %v722_v15 }
 0x206   : > { %v2525_v16 = vpop.eup %2524 }
 0x207   : > { %v724_v18 = vmul.f32 %v2525_v16, %v716_v4 }
 0x209   : > { %v731_v20 = vmul.f32 %v2157_v17, %v724_v18 }
 0x20b   : > { %v738_v21 = vadd.f32 %v2158_v19, %v731_v20 }
 0x20d   : > { %v739_v23 = vpack.c.bf16 %v738_v21, %v738_v21 }
 0x20f   : > { %741 = vst.msk [vmem:[#allocation2] sm:$0xf] %vm740_vm4, %v739_v23  ;;  %2268 = vmatmul.mubr.msk.bf16.vlgmr.msra.gmra.mrb[0].mxu0 %vm710_vm0, %v739_v23  ;;  %2276 = vmatmul.mubr.msk.bf16.vlgmr.msra.gmra.mrb[0].mxu1 %vm710_vm0, %v739_v23 }
 0x210   : > { %2280 = vmatpush3.bf16.msra.mxu0 %v2522_v22  ;;  %2283 = vmatprep.mubr.msk.bf16.mxu0 %vm2879_vm3, %v2877_v8 }
 0x211   : > { %2281 = vmatprep.subr.bf16.mxu0 %v2877_v8 }
 0x214   : > { %2282 = vmatpush3.bf16.msra.mxu0 %v2523_v24 }
 0x216   : > { %v916_v25 = vld [vmem:[#allocation2] sm:$0xf] }
 0x217   : > { %2284 = vmatmul.mubr.msk.bf16.vlgmr.msra.gmra.mrb[4].mxu0 %vm710_vm0, %v916_v25 }
 0x2e2   : > { %v802_v28 = vpop.f32.mrb[0].mxu0  ;;  %v866_v29 = vpop.f32.mrb[0].mxu1 }
 0x2e3   : > { %v803_v30 = vadd.f32 %v2159_v26, %v802_v28  ;;  %v867_v31 = vadd.f32 %v2163_v27, %v866_v29  ;;  %v2269_v32 = vpop.f32.mrb[1].mxu0  ;;  %v2277_v33 = vpop.f32.mrb[1].mxu1 }
 0x2e4   : > { %v805_v34 = vpop.f32.mrb[2].mxu0  ;;  %v869_v35 = vpop.f32.mrb[2].mxu1 }
 0x2e5   : > { %v808_v36 = vpack.c.bf16 %v803_v30, %v803_v30  ;;  %v872_v37 = vpack.c.bf16 %v867_v31, %v867_v31  ;;  %v2270_v38 = vpop.f32.mrb[3].mxu0  ;;  %v2278_v39 = vpop.f32.mrb[3].mxu1 }
 0x2e7   : > { %874 = vst.msk [vmem:[#allocation4] sm:$0xf] %vm873_vm5, %v808_v36  ;;  %875 = vst.msk [vmem:[#allocation5] sm:$0xf] %vm873_vm5, %v872_v37  ;;  %892 = vrot.lane.b32.xlu0 %v808_v36, %s2880_s15  ;;  %879 = vrot.lane.b32.xlu1 %v808_v36, %s2881_s17 }
 0x2ea   : > { %v978_v41 = vpop.f32.mrb[4].mxu0 }
 0x2eb   : > { %v979_v42 = vadd.f32 %v2169_v40, %v978_v41  ;;  %887 = vrot.lane.b32.xlu1 %v872_v37, %s2881_s17  ;;  %v2285_v43 = vpop.f32.mrb[5].mxu0 }
 0x2ec   : > { %v981_v44 = vpop.f32.mrb[6].mxu0 }
 0x2ed   : > { %v984_v45 = vpack.c.bf16 %v979_v42, %v979_v42  ;;  %v2286_v46 = vpop.f32.mrb[7].mxu0 }
 0x2ef   : > { %986 = vst.msk [vmem:[#allocation3] sm:$0xf] %vm873_vm5, %v984_v45  ;;  %897 = vrot.lane.b32.xlu1 %v872_v37, %s2880_s15 }
 0x2f3   : > { %902 = vrot.lane.b32.xlu1 %v808_v36, %s2882_s26 }
 0x2f7   : > { %907 = vrot.lane.b32.xlu1 %v872_v37, %s2882_s26 }
 0x2fb   : > { %990 = vrot.lane.b32.xlu1 %v984_v45, %s2881_s17 }
 0x2ff   : > { %995 = vrot.lane.b32.xlu1 %v984_v45, %s2880_s15 }
 0x303   : > { %1000 = vrot.lane.b32.xlu1 %v984_v45, %s2882_s26 }
 0x359   : > { %v893_v50 = vpop.permute.xlu0 %892  ;;  %v880_v51 = vpop.permute.xlu1 %879 }
 0x35a   : > { %896 = vst.msk [vmem:[#allocation4 + $0x8] sm:$0xf] %vm873_vm5, %v893_v50  ;;  %883 = vst.msk [vmem:[#allocation4 + $0x4] sm:$0xf] %vm873_vm5, %v880_v51 }
 0x35d   : > { %v888_v52 = vpop.permute.xlu1 %887 }
 0x35e   : > { %891 = vst.msk [vmem:[#allocation5 + $0x4] sm:$0xf] %vm873_vm5, %v888_v52 }
 0x361   : > { %v898_v53 = vpop.permute.xlu1 %897 }
 0x362   : > { %901 = vst.msk [vmem:[#allocation5 + $0x8] sm:$0xf] %vm873_vm5, %v898_v53 }
 0x365   : > { %v903_v54 = vpop.permute.xlu1 %902 }
 0x366   : > { %906 = vst.msk [vmem:[#allocation4 + $0xc] sm:$0xf] %vm873_vm5, %v903_v54 }
 0x369   : > { %v908_v55 = vpop.permute.xlu1 %907 }
 0x36a   : > { %911 = vst.msk [vmem:[#allocation5 + $0xc] sm:$0xf] %vm873_vm5, %v908_v55 }
 0x36d   : > { %v991_v56 = vpop.permute.xlu1 %990 }
 0x36e   : > { %994 = vst.msk [vmem:[#allocation3 + $0x4] sm:$0xf] %vm873_vm5, %v991_v56 }
 0x371   : > { %v996_v57 = vpop.permute.xlu1 %995 }
 0x372   : > { %999 = vst.msk [vmem:[#allocation3 + $0x8] sm:$0xf] %vm873_vm5, %v996_v57 }
 0x375   : > { %v1001_v58 = vpop.permute.xlu1 %1000 }
 0x376   : > { %1004 = vst.msk [vmem:[#allocation3 + $0xc] sm:$0xf] %vm873_vm5, %v1001_v58 }
 0x377 LB: >> { %v2883_v59 = vmov 0.0   ;;  %vm2884_vm6 = vmmov 0   ;;  %s2174_s0 = sshll.u32 %s2868_s21, 3  ;;  %v1036_v62 = vld [vmem:[#allocation3] sm:$0xf]  ;;  %v2885_v9 = vmov 0   ;;  %s2868_s21 = sphi %s3324_s21, %s1029_s21  }
 0x378   : >> { %2287 = vmatprep.subr.bf16.mxu0 %v2883_v59  ;;  %2289 = vmatprep.mubr.msk.bf16.mxu0 %vm2884_vm6, %v2883_v59  ;;  %s3336_s25 = sshra.s32 %s2174_s0, 3  ;;  %v1033_v63 = vstv %s2174_s0  ;;  %v1093_v10 = vld [vmem:[#allocation6] sm:$0xff]  ;;  %vm1127_vm8 = vcmask 1043456   ;;  %v1174_v26 = vld [vmem:[#allocation3 + $0x4] sm:$0xf]  ;;  %s1029_s21 = sadd.s32 1, %s2868_s21  }
 0x379   : >> { %2293 = vmatprep.subr.bf16.mxu1 %v2883_v59  ;;  %2295 = vmatprep.mubr.msk.bf16.mxu1 %vm2884_vm6, %v2883_v59  ;;  %s2175_s24 = sshll.u32 %s3336_s25, 2  ;;  %v3350_v0 = vadd.s32 %v1033_v63, %v3312_v49  ;;  %v1313_v29 = vld [vmem:[#allocation3 + $0x8] sm:$0xf]  ;;  %v1116_v32 = vld [vmem:[#allocation8] sm:$0xff]  ;;  %p1028_p2 = scmp.ge.s32.totalorder %s1029_s21, 1 }
 0x37a   : >> { %s3341_s19 = scalar_lea.vmem [#allocation4], %s2175_s24  ;;  %2526 = vset.pattern.permute.xlu0 %v2885_v9  ;;  %2527 = vset.pattern.permute.xlu1 %v2885_v9  ;;  %s3361_s20 = scalar_lea.vmem [#allocation5], %s2175_s24  ;;  %vm1646_vm9 = vcmask (%p1028_p2), 130048   ;;  %vm1648_vm10 = vcmask (%p1028_p2), 195584  }
 0x37b   : >> { %v1041_v60 = vld [vmem:[%s3341_s19] sm:$0xf]  ;;  %vm1035_vm7 = vcmp.ge.s32.totalorder %v3310_v48, %v3350_v0  ;;  %v2180_v21 = vld [vmem:[%s3341_s19 + $0x4] sm:$0xf]  ;;  %v2186_v25 = vld [vmem:[%s3341_s19 + $0x8] sm:$0xf] }
 0x37c   : >> { %v1049_v61 = vsel %vm1014_vm2, %v1041_v60, 0  ;;  %v1044_v15 = vld [vmem:[%s3361_s20] sm:$0xf]  ;;  %v1186_v24 = vsel %vm1014_vm2, %v2180_v21, 0  ;;  %v1325_v27 = vsel %vm1014_vm2, %v2186_v25, 0  ;;  %v1509_v0 = vld [vmem:[#allocation6 + $0x18] sm:$0xff] }
 0x37d   : >> { %2288 = vmatpush3.bf16.xpose.msra.mxu0 %v1049_v61  ;;  %v1129_v16 = vsel %vm1127_vm8, %v1044_v15, 0  ;;  %v2192_v28 = vld [vmem:[%s3341_s19 + $0xc] sm:$0xf]  ;;  %v1452_v31 = vld [vmem:[#allocation3 + $0xc] sm:$0xf]  ;;  %s2887_s17 = smov (%p1028_p2), 8  }
 0x37e   : >> { %2305 = vmatprep.subr.bf16.mxu0 %v2883_v59  ;;  %2294 = vmatpush3.bf16.msra.mxu1 %v1129_v16  ;;  %v1464_v30 = vsel %vm1014_vm2, %v2192_v28, 0  ;;  %v2188_v28 = vld [vmem:[%s3361_s20 + $0x8] sm:$0xf]  ;;  %s2888_s26 = smov (%p1028_p2), 16   ;;  %s2889_s21 = smov (%p1028_p2), 24  }
 0x37f   : >> { %2299 = vmatprep.subr.bf16.mxu1 %v2883_v59  ;;  %s3625_s15 = sld [smem:[#allocation38_spill]] (%p1028_p2)  ;;  %s3627_s0 = sld [smem:[#allocation32_spill]] (%p1028_p2) }
 0x380   : > { %s1954_s25 = sshll.u32 (%p1028_p2), %s689_s22, 4  ;;  %s2890_s23 = smov (%p1028_p2), [#allocation21]   ;;  %s3517_s25 = int_to_ptr.vmem [resolvable:$true] %s1954_s25 }
 0x381   : > { %s2766_s29 = scalar_lea.vmem (%p1028_p2), %s3517_s25, 128 }
 0x382   : > { %p2767_p4 = scmp.ne.s32.totalorder (%p1028_p2), %s3517_s25, %s2766_s29 }
 0x384   : >> { %2290 = vmatmul.mubr.msk.bf16.vlgmr.msra.gmra.mrb[0].mxu0 %vm1014_vm2, %v1036_v62 }
 0x385   : >> { %2307 = vmatprep.mubr.msk.bf16.mxu0 %vm2884_vm6, %v2883_v59  ;;  %p3629_p8 = scmp.ne.s32.totalorder (%p1028_p2), %s3627_s0, 0 }
 0x387   : > { %p2768_p10 = pnand (%p1028_p2), %p2767_p4, %p3629_p8 }
 0x389   : > { %p2769_p11 = pneg (%p1028_p2), %p2768_p10 }
 0x457   : >> { %v1085_v1 = vpop.f32.mrb[0].mxu0 }
 0x458   : >> { %v1091_v2 = vmul.f32 0.35355338, %v1085_v1  ;;  %v2291_v3 = vpop.f32.mrb[1].mxu0  ;;  %v1231_v1 = vld [vmem:[#allocation6 + $0x8] sm:$0xff] }
 0x459   : >> { %v1088_v4 = vpop.f32.mrb[2].mxu0 }
 0x45a   : >> { %v2292_v5 = vpop.f32.mrb[3].mxu0  ;;  %v1092_v6 = vsel %vm1035_vm7, %v1091_v2, -1e+09  ;;  %v1370_v4 = vld [vmem:[#allocation6 + $0x10] sm:$0xff] }
 0x45b   : >> { %v1094_v7 = vsel %vm1014_vm2, %v1092_v6, -inf }
 0x45c   : >> { %1095 = vmax.xlane.f32.xlu0 %v1094_v7 }
 0x4e9   : >> { %v1096_v11 = vpop.xlane.xlu0 %1095 }
 0x4ea   : >> { %v1097_v12 = vmax.f32 %v1093_v10, %v1096_v11 }
 0x4ec   : >> { %v1098_v13 = vsub.f32 %v1093_v10, %v1097_v12  ;;  %1173 = vst.msk [vmem:[#allocation6] sm:$0xff] %vm1005_vm1, %v1097_v12  ;;  %1103 = vperm.xlu0 %2526, %v1097_v12   ;;  %v2182_v10 = vld [vmem:[%s3361_s20 + $0x4] sm:$0xf] }
 0x4ed   : >> { %v1268_v12 = vsel %vm1127_vm8, %v2182_v10, 0 }
 0x4ee   : >> { %v1099_v14 = vmul.f32 1.442695, %v1098_v13  ;;  %2306 = vmatpush3.bf16.msra.mxu0 %v1268_v12 }
 0x4ef   : >> { %2317 = vmatprep.subr.bf16.mxu0 %v2883_v59 }
 0x4f0   : >> { %2528 = vpow2.f32 %v1099_v14 }
 0x4fa   : >> { %v3366_v17 = vpop.eup %2528 }
 0x4fb   : >> { %1119 = vperm.xlu0 %2526, %v3366_v17  }
 0x56b   : >> { %v1104_v18 = vpop.permute.xlu0 %1103 }
 0x56c   : >> { %v1106_v19 = vsub.f32 %v1092_v6, %v1104_v18 }
 0x56e   : >> { %v1107_v20 = vmul.f32 1.442695, %v1106_v19 }
 0x570   : >> { %2530 = vpow2.f32 %v1107_v20 }
 0x57a   : >> { %v3370_v22 = vpop.eup %2530  ;;  %v1120_v33 = vpop.permute.xlu0 %1119 }
 0x57b   : >> { %v1123_v23 = vpack.c.bf16 %v3370_v22, %v3370_v22  ;;  %v1122_v34 = vmul.f32 %v1120_v33, %v1116_v32  ;;  %v1111_v18 = vsel %vm1014_vm2, %v3370_v22, 0.0  ;;  %v1407_v32 = vsel %vm1127_vm8, %v2188_v28, 0 }
 0x57c   : > { %v2886_v28 = vmov (%p1028_p2), 0  }
 0x57d   : >> { %2296 = vmatmul.mubr.msk.bf16.vlgmr.msra.gmra.mrb[0].mxu1 %vm1014_vm2, %v1123_v23 }
 0x57e   : >> { %2300 = vmatpush3.bf16.xpose.msra.mxu1 %v1186_v24  ;;  %2301 = vmatprep.mubr.msk.bf16.mxu1 %vm2884_vm6, %v2883_v59 }
 0x57f   : >> { %2311 = vmatprep.subr.bf16.mxu1 %v2883_v59 }
 0x585   : >> { %2302 = vmatmul.mubr.msk.bf16.vlgmr.msra.gmra.mrb[4].mxu1 %vm1014_vm2, %v1174_v26 }
 0x586   : >> { %2312 = vmatpush3.bf16.xpose.msra.mxu1 %v1325_v27  ;;  %2313 = vmatprep.mubr.msk.bf16.mxu1 %vm2884_vm6, %v2883_v59 }
 0x587   : >> { %2323 = vmatprep.subr.bf16.mxu1 %v2883_v59 }
 0x58d   : >> { %2314 = vmatmul.mubr.msk.bf16.vlgmr.msra.gmra.mrb[8].mxu1 %vm1014_vm2, %v1313_v29 }
 0x58e   : >> { %2324 = vmatpush3.bf16.xpose.msra.mxu1 %v1464_v30  ;;  %2325 = vmatprep.mubr.msk.bf16.mxu1 %vm2884_vm6, %v2883_v59 }
 0x58f   : > { %2335 = vmatprep.subr.bf16.mxu1 (%p1028_p2), %v2877_v8 }
 0x595   : >> { %2326 = vmatmul.mubr.msk.bf16.vlgmr.msra.gmra.mrb[12].mxu1 %vm1014_vm2, %v1452_v31 }
 0x596   : > { %2339 = vmatprep.mubr.msk.bf16.mxu1 (%p1028_p2), %vm2879_vm3, %v2877_v8 }
 0x650   : >> { %v1165_v35 = vpop.f32.mrb[0].mxu1 }
 0x651   : >> { %v1171_v36 = vadd.f32 %v1165_v35, %v1122_v34  ;;  %v2297_v37 = vpop.f32.mrb[1].mxu1  ;;  %v2194_v35 = vld [vmem:[%s3361_s20 + $0xc] sm:$0xf]  ;;  %s3628_s20 = sld [smem:[#allocation40_spill]] (%p1028_p2) }
 0x652   : >> { %v1168_v38 = vpop.f32.mrb[2].mxu1 }
 0x653   : >> { %1172 = vst.msk [vmem:[#allocation8] sm:$0xff] %vm1014_vm2, %v1171_v36  ;;  %v2298_v39 = vpop.f32.mrb[3].mxu1 }
 0x654   : >> { %v1546_v39 = vsel %vm1127_vm8, %v2194_v35, 0 }
 0x658   : >> { %v1222_v40 = vpop.f32.mrb[4].mxu1 }
 0x659   : >> { %v1228_v41 = vmul.f32 0.35355338, %v1222_v40  ;;  %v2303_v42 = vpop.f32.mrb[5].mxu1 }
 0x65a   : >> { %v1225_v43 = vpop.f32.mrb[6].mxu1 }
 0x65b   : >> { %v2304_v44 = vpop.f32.mrb[7].mxu1  ;;  %v1229_v45 = vsel %vm1035_vm7, %v1228_v41, -1e+09 }
 0x65c   : >> { %v1232_v46 = vsel %vm1014_vm2, %v1229_v45, -inf }
 0x65d   : >> { %1233 = vmax.xlane.f32.xlu1 %v1232_v46 }
 0x660   : >> { %v1361_v47 = vpop.f32.mrb[8].mxu1 }
 0x661   : >> { %v1367_v50 = vmul.f32 0.35355338, %v1361_v47  ;;  %v2315_v51 = vpop.f32.mrb[9].mxu1 }
 0x662   : >> { %v1364_v52 = vpop.f32.mrb[10].mxu1 }
 0x663   : >> { %v2316_v53 = vpop.f32.mrb[11].mxu1  ;;  %v1368_v54 = vsel %vm1035_vm7, %v1367_v50, -1e+09 }
 0x664   : >> { %v1371_v55 = vsel %vm1014_vm2, %v1368_v54, -inf }
 0x665   : >> { %1372 = vmax.xlane.f32.xlu1 %v1371_v55  ;;  %v1387_v55 = vld [vmem:[#allocation7 + $0x10] sm:$0xff] }
 0x668   : >> { %v1500_v56 = vpop.f32.mrb[12].mxu1 }
 0x669   : >> { %v1506_v57 = vmul.f32 0.35355338, %v1500_v56  ;;  %v2327_v58 = vpop.f32.mrb[13].mxu1 }
 0x66a   : >> { %v1503_v60 = vpop.f32.mrb[14].mxu1 }
 0x66b   : >> { %v2328_v61 = vpop.f32.mrb[15].mxu1  ;;  %v1507_v62 = vsel %vm1035_vm7, %v1506_v57, -1e+09 }
 0x66c   : >> { %v1510_v63 = vsel %vm1014_vm2, %v1507_v62, -inf  ;;  %v1526_v61 = vld [vmem:[#allocation7 + $0x18] sm:$0xff] }
 0x66d   : >> { %1511 = vmax.xlane.f32.xlu1 %v1510_v63 }
 0x6ea   : >> { %v1234_v2 = vpop.xlane.xlu1 %1233 }
 0x6eb   : >> { %v1235_v3 = vmax.f32 %v1231_v1, %v1234_v2 }
 0x6ed   : >> { %1312 = vst.msk [vmem:[#allocation6 + $0x8] sm:$0xff] %vm1005_vm1, %v1235_v3  ;;  %1241 = vperm.xlu1 %2527, %v1235_v3   ;;  %v1236_v16 = vsub.f32 %v1231_v1, %v1235_v3  ;;  %v1256_v1 = vld [vmem:[#allocation8 + $0x8] sm:$0xff] }
 0x6ef   : >> { %v1237_v19 = vmul.f32 1.442695, %v1236_v16 }
 0x6f2   : >> { %v1373_v5 = vpop.xlane.xlu1 %1372 }
 0x6f3   : >> { %v1374_v6 = vmax.f32 %v1370_v4, %v1373_v5 }
 0x6f5   : >> { %v1375_v7 = vsub.f32 %v1370_v4, %v1374_v6  ;;  %1451 = vst.msk [vmem:[#allocation6 + $0x10] sm:$0xff] %vm1005_vm1, %v1374_v6  ;;  %1380 = vperm.xlu1 %2527, %v1374_v6  }
 0x6f7   : >> { %v1376_v9 = vmul.f32 1.442695, %v1375_v7 }
 0x6f9   : >> { %2532 = vpow2.f32 %v1376_v9  ;;  %v1395_v9 = vld [vmem:[#allocation8 + $0x10] sm:$0xff] }
 0x6fa   : >> { %v1512_v11 = vpop.xlane.xlu1 %1511  ;;  %2534 = vpow2.f32 %v1237_v19 }
 0x6fb   : >> { %v1513_v13 = vmax.f32 %v1509_v0, %v1512_v11 }
 0x6fd   : >> { %v1514_v14 = vsub.f32 %v1509_v0, %v1513_v13  ;;  %1590 = vst.msk [vmem:[#allocation6 + $0x18] sm:$0xff] %vm1005_vm1, %v1513_v13  ;;  %1519 = vperm.xlu1 %2527, %v1513_v13  }
 0x6ff   : >> { %v1515_v41 = vmul.f32 1.442695, %v1514_v14 }
 0x703   : >> { %v2533_v15 = vpop.eup %2532 }
 0x704   : >> { %1398 = vperm.xlu0 %2526, %v2533_v15   ;;  %v2535_v20 = vpop.eup %2534  ;;  %v1388_v56 = vmul.f32 %v2533_v15, %v1387_v55  ;;  %v1534_v15 = vld [vmem:[#allocation8 + $0x18] sm:$0xff]  ;;  %v1717_v55 = vld [vmem:[%s3242_s1] sm:$0xff] (%p1028_p2)  ;;  %s2217_s1 = sshll.u32 (%p1028_p2), %s2856_s30, 7  ;;  %s1940_s30 = scalar_lea.sflag (%p1028_p2), [#allocation11], %s687_s27 }
 0x705   : > { %s3515_s2 = scalar_lea.hbm (%p1028_p2), %s3628_s20, %s2217_s1 }
 0x721   : >> { %1112 = vadd.xlane.f32.xlu1 %v1111_v18 }
 0x732   : >> { %1259 = vperm.xlu1 %2527, %v2535_v20  }
 0x736   : > { %2545 = vset.pattern.permute.xlu1 (%p1028_p2), %v2886_v28 }
 0x76c   : >> { %v1242_v21 = vpop.permute.xlu1 %1241 }
 0x76d   : >> { %v1244_v23 = vsub.f32 %v1229_v45, %v1242_v21  ;;  %v1109_v45 = vld [vmem:[#allocation7] sm:$0xff] }
 0x76e   : >> { %v1110_v46 = vmul.f32 %v3366_v17, %v1109_v45 }
 0x76f   : >> { %v1245_v24 = vmul.f32 1.442695, %v1244_v23 }
 0x771   : >> { %2536 = vpow2.f32 %v1245_v24 }
 0x774   : >> { %v1381_v25 = vpop.permute.xlu1 %1380 }
 0x775   : >> { %v1383_v26 = vsub.f32 %v1368_v54, %v1381_v25 }
 0x777   : >> { %v1384_v27 = vmul.f32 1.442695, %v1383_v26 }
 0x779   : >> { %2538 = vpow2.f32 %v1384_v27 }
 0x77b   : >> { %v2537_v29 = vpop.eup %2536 }
 0x77c   : >> { %v1520_v30 = vpop.permute.xlu1 %1519  ;;  %v1250_v31 = vsel %vm1014_vm2, %v2537_v29, 0.0  ;;  %v1263_v22 = vpack.c.bf16 %v2537_v29, %v2537_v29 }
 0x77d   : >> { %v1522_v33 = vsub.f32 %v1507_v62, %v1520_v30  ;;  %1251 = vadd.xlane.f32.xlu0 %v1250_v31 }
 0x77e   : >> { %2308 = vmatmul.mubr.msk.bf16.vlgmr.msra.gmra.mrb[4].mxu0 %vm1014_vm2, %v1263_v22  ;;  %v2546_v22 = vld [vmem:[%s3577_s10] sm:$0xff] (%p1028_p2)  }
 0x77f   : >> { %v1523_v34 = vmul.f32 1.442695, %v1522_v33  ;;  %2318 = vmatpush3.bf16.msra.mxu0 %v1407_v32  ;;  %2319 = vmatprep.mubr.msk.bf16.mxu0 %vm2884_vm6, %v2883_v59  ;;  %v2547_v32 = vld [vmem:[%s3577_s10 + $0x8] sm:$0xff] (%p1028_p2)  }
 0x780   : >> { %2329 = vmatprep.subr.bf16.mxu0 %v2883_v59  ;;  %2336 = vmatpush3.bf16.msra.mxu1 (%p1028_p2), %v2546_v22 }
 0x781   : >> { %2540 = vpow2.f32 %v1523_v34  ;;  %2337 = vmatprep.subr.bf16.mxu1 (%p1028_p2), %v2877_v8 }
 0x782   : >> { %2542 = vpow2.f32 %v1515_v41 }
 0x783   : >> { %v2539_v36 = vpop.eup %2538  ;;  %v1399_v51 = vpop.permute.xlu0 %1398 }
 0x784   : >> { %v1389_v37 = vsel %vm1014_vm2, %v2539_v36, 0.0  ;;  %v1402_v38 = vpack.c.bf16 %v2539_v36, %v2539_v36  ;;  %v1401_v0 = vmul.f32 %v1399_v51, %v1395_v9  ;;  %2338 = vmatpush3.bf16.msra.mxu1 (%p1028_p2), %v2547_v32 }
 0x785   : >> { %1390 = vadd.xlane.f32.xlu0 %v1389_v37  ;;  %2343 = vmatprep.subr.bf16.mxu1 (%p1028_p2), %v2877_v8 }
 0x786   : >> { %2320 = vmatmul.mubr.msk.bf16.vlgmr.msra.gmra.mrb[8].mxu0 %vm1014_vm2, %v1402_v38 }
 0x787   : >> { %2330 = vmatpush3.bf16.msra.mxu0 %v1546_v39  ;;  %2331 = vmatprep.mubr.msk.bf16.mxu0 %vm2884_vm6, %v2883_v59  ;;  %v1248_v59 = vld [vmem:[#allocation7 + $0x8] sm:$0xff] }
 0x788   : >> { %v1249_v52 = vmul.f32 %v2535_v20, %v1248_v59  ;;  %2351 = vmatprep.subr.bf16.mxu0 (%p1028_p2), %v2877_v8 }
 0x78b   : >> { %v2541_v40 = vpop.eup %2540 }
 0x78c   : >> { %v1528_v42 = vsel %vm1014_vm2, %v2541_v40, 0.0  ;;  %v1541_v43 = vpack.c.bf16 %v2541_v40, %v2541_v40  ;;  %v2543_v44 = vpop.eup %2542 }
 0x78d   : >> { %1529 = vadd.xlane.f32.xlu1 %v1528_v42  ;;  %v1527_v17 = vmul.f32 %v2543_v44, %v1526_v61 }
 0x78e   : >> { %2332 = vmatmul.mubr.msk.bf16.vlgmr.msra.gmra.mrb[12].mxu0 %vm1014_vm2, %v1541_v43  ;;  %v1591_v43 = vld [vmem:[#allocation8] sm:$0xff] (%p1028_p2) }
 0x78f   : > { %2367 = vmatprep.mubr.msk.bf16.mxu0 (%p1028_p2), %vm2879_vm3, %v2877_v8 }
 0x79b   : >> { %1537 = vperm.xlu0 %2526, %v2543_v44  }
 0x79f   : > { %2544 = vset.pattern.permute.xlu0 (%p1028_p2), %v2886_v28 }
 0x7ae   : >> { %v1113_v47 = vpop.xlane.xlu1 %1112 }
 0x7af   : >> { %v1114_v50 = vadd.f32 %v1113_v47, %v1110_v46 }
 0x7b1   : >> { %1115 = vst.msk [vmem:[#allocation7] sm:$0xff] %vm1005_vm1, %v1114_v50 }
 0x7b2   : >> { %v1260_v60 = vpop.permute.xlu1 %1259 }
 0x7b3   : >> { %v1262_v2 = vmul.f32 %v1260_v60, %v1256_v1 }
 0x7b8   : > { %v1592_v29 = vld [vmem:[#allocation7] sm:$0xff] (%p1028_p2) }
 0x80a   : >> { %v1252_v53 = vpop.xlane.xlu0 %1251 }
 0x80b   : >> { %v1253_v54 = vadd.f32 %v1252_v53, %v1249_v52  ;;  %v2197_v53 = vld [vmem:[#allocation17] ss:$0 sm:$0xff] (%p1028_p2) }
 0x80d   : >> { %1254 = vst.msk [vmem:[#allocation7 + $0x8] sm:$0xff] %vm1005_vm1, %v1253_v54 }
 0x812   : >> { %v1391_v57 = vpop.xlane.xlu0 %1390 }
 0x813   : >> { %v1392_v58 = vadd.f32 %v1391_v57, %v1388_v56 }
 0x814   : > { %v1603_v25 = vld [vmem:[#allocation7 + $0x8] sm:$0xff] (%p1028_p2) }
 0x815   : >> { %1393 = vst.msk [vmem:[#allocation7 + $0x10] sm:$0xff] %vm1005_vm1, %v1392_v58  ;;  %2558 = vrcp.f32 (%p1028_p2), %v1603_v25  ;;  %v2557_v25 = vld [vmem:[%s3583_s16 + $0x38] sm:$0xff] (%p1028_p2)  }
 0x81a   : >> { %v1530_v62 = vpop.xlane.xlu1 %1529  ;;  %v1538_v16 = vpop.permute.xlu0 %1537 }
 0x81b   : >> { %v1531_v63 = vadd.f32 %v1530_v62, %v1527_v17  ;;  %v1540_v18 = vmul.f32 %v1538_v16, %v1534_v15 }
 0x81c   : > { %v1614_v27 = vld [vmem:[#allocation7 + $0x10] sm:$0xff] (%p1028_p2) }
 0x81d   : >> { %1532 = vst.msk [vmem:[#allocation7 + $0x18] sm:$0xff] %vm1005_vm1, %v1531_v63 }
 0x81f   : > { %v2559_v48 = vpop.eup (%p1028_p2), %2558 }
 0x820   : > { %1607 = vperm.xlu0 (%p1028_p2), %2544, %v2559_v48  }
 0x824   : > { %v1625_v26 = vld [vmem:[#allocation7 + $0x18] sm:$0xff] (%p1028_p2) }
 0x825   : > { %2560 = vrcp.f32 (%p1028_p2), %v1625_v26  ;;  %v2203_v26 = vld [vmem:[%s3625_s15] ss:$0 sm:$0xff] (%p1028_p2)  ;;  %s2770_s15 = sshll.u32 (%p1028_p2), %s2890_s23, 4  ;;  %s2771_s15 = int_to_ptr.vmem [resolvable:$false] %s2770_s15 }
 0x826   : > { %2562 = vrcp.f32 (%p1028_p2), %v1614_v27  ;;  %p2773_p3 = scmp.lt.s32.totalorder (%p1028_p2), %s3517_s25, %s2771_s15 }
 0x827   : > { %2564 = vrcp.f32 (%p1028_p2), %v1592_v29 }
 0x82f   : > { %v2561_v49 = vpop.eup (%p1028_p2), %2560 }
 0x830   : > { %v2563_v30 = vpop.eup (%p1028_p2), %2562  ;;  %1629 = vperm.xlu1 (%p1028_p2), %2545, %v2561_v49  }
 0x831   : > { %v2565_v31 = vpop.eup (%p1028_p2), %2564  ;;  %1618 = vperm.xlu0 (%p1028_p2), %2544, %v2563_v30  }
 0x834   : > { %1596 = vperm.xlu1 (%p1028_p2), %2545, %v2565_v31  }
 0x851   : >> { %v1304_v3 = vpop.f32.mrb[4].mxu0 }
 0x852   : >> { %v1310_v4 = vadd.f32 %v1304_v3, %v1262_v2  ;;  %v2309_v5 = vpop.f32.mrb[5].mxu0 }
 0x853   : >> { %v1307_v6 = vpop.f32.mrb[6].mxu0  ;;  %v2549_v5 = vld [vmem:[%s3581_s14 + $0x8] sm:$0xff] (%p1028_p2)  }
 0x854   : >> { %1311 = vst.msk [vmem:[#allocation8 + $0x8] sm:$0xff] %vm1014_vm2, %v1310_v4  ;;  %v2310_v7 = vpop.f32.mrb[7].mxu0  ;;  %v2548_v4 = vld [vmem:[%s3581_s14] sm:$0xff] (%p1028_p2)  }
 0x855   : > { %v2550_v6 = vld [vmem:[%s3583_s16] sm:$0xff] (%p1028_p2)  }
 0x856   : > { %2352 = vmatpush3.bf16.msra.mxu0 (%p1028_p2), %v2550_v6 }
 0x857   : > { %2353 = vmatprep.subr.bf16.mxu0 (%p1028_p2), %v2877_v8 }
 0x859   : >> { %v1443_v10 = vpop.f32.mrb[8].mxu0 }
 0x85a   : >> { %v1449_v11 = vadd.f32 %v1443_v10, %v1401_v0  ;;  %v2321_v12 = vpop.f32.mrb[9].mxu0 }
 0x85b   : >> { %v1446_v13 = vpop.f32.mrb[10].mxu0  ;;  %v1601_v33 = vld [vmem:[#allocation8 + $0x8] sm:$0xff] (%p1028_p2) }
 0x85c   : >> { %1450 = vst.msk [vmem:[#allocation8 + $0x10] sm:$0xff] %vm1014_vm2, %v1449_v11  ;;  %v2322_v14 = vpop.f32.mrb[11].mxu0  ;;  %v2201_v11 = vld [vmem:[#allocation18] ss:$0 sm:$0xff] (%p1028_p2)  ;;  %v2202_v13 = vld [vmem:[#allocation20] ss:$0 sm:$0xff] (%p1028_p2) }
 0x85e   : > { %1031 = sbr.rel (!%p1028_p2) target bundleno = 887 (0x377), region = 203 }
 0x861   : >> { %v1582_v19 = vpop.f32.mrb[12].mxu0 }
 0x862   : >> { %v1588_v20 = vadd.f32 %v1582_v19, %v1540_v18  ;;  %v2333_v21 = vpop.f32.mrb[13].mxu0  ;;  %v2551_v18 = vld [vmem:[%s3583_s16 + $0x8] sm:$0xff] (%p1028_p2)   ;;  %v2552_v19 = vld [vmem:[%s3583_s16 + $0x10] sm:$0xff] (%p1028_p2)  }
 0x863   : >> { %v1585_v23 = vpop.f32.mrb[14].mxu0  ;;  %v1612_v38 = vld [vmem:[#allocation8 + $0x10] sm:$0xff] (%p1028_p2)  ;;  %2354 = vmatpush3.bf16.msra.mxu0 (%p1028_p2), %v2551_v18 }
 0x864   : >> { %1589 = vst.msk [vmem:[#allocation8 + $0x18] sm:$0xff] %vm1014_vm2, %v1588_v20  ;;  %v2334_v24 = vpop.f32.mrb[15].mxu0  ;;  %2355 = vmatprep.subr.bf16.mxu0 (%p1028_p2), %v2877_v8  ;;  %v2553_v20 = vld [vmem:[%s3583_s16 + $0x18] sm:$0xff] (%p1028_p2)   ;;  %v2554_v21 = vld [vmem:[%s3583_s16 + $0x20] sm:$0xff] (%p1028_p2)   ;;  %v2555_v23 = vld [vmem:[%s3583_s16 + $0x28] sm:$0xff] (%p1028_p2)  }
 0x865   : > { %v2556_v24 = vld [vmem:[%s3583_s16 + $0x30] sm:$0xff]  }
 0x867   : > { %2356 = vmatpush3.bf16.msra.mxu0 %v2552_v19 }
 0x868   : > { %2357 = vmatprep.subr.bf16.mxu0 %v2877_v8 }
 0x86b   : > { %v1623_v35 = vld [vmem:[#allocation8 + $0x18] sm:$0xff]  ;;  %2358 = vmatpush3.bf16.msra.mxu0 %v2553_v20 }
 0x86c   : > { %2359 = vmatprep.subr.bf16.mxu0 %v2877_v8 }
 0x86f   : > { %2360 = vmatpush3.bf16.msra.mxu0 %v2554_v21 }
 0x870   : > { %2361 = vmatprep.subr.bf16.mxu0 %v2877_v8 }
 0x873   : > { %2362 = vmatpush3.bf16.msra.mxu0 %v2555_v23 }
 0x874   : > { %2363 = vmatprep.subr.bf16.mxu0 %v2877_v8 }
 0x877   : > { %2364 = vmatpush3.bf16.msra.mxu0 %v2556_v24 }
 0x878   : > { %2365 = vmatprep.subr.bf16.mxu0 %v2877_v8 }
 0x87b   : > { %2366 = vmatpush3.bf16.msra.mxu0 %v2557_v25 }
 0x89f   : > { %v1608_v34 = vpop.permute.xlu0 %1607 }
 0x8a0   : > { %v1610_v36 = vmul.f32 %v1608_v34, %v1601_v33 }
 0x8a2   : > { %1634 = vrot.lane.b32.xlu0 %v1610_v36, %s2887_s17  ;;  %s2772_s17 = scalar_lea.vmem %s2771_s15, 256 }
 0x8a3   : > { %p2774_p5 = scmp.lt.s32.totalorder %s2772_s17, %s2766_s29 }
 0x8a5   : > { %p2775_p6 = por %p2774_p5, %p2773_p3 }
 0x8a7   : > { %p2776_p7 = pnand %p2775_p6, %p2769_p11 }
 0x8af   : > { %v1630_v37 = vpop.permute.xlu1 %1629 }
 0x8b0   : > { %v1632_v39 = vmul.f32 %v1630_v37, %v1623_v35  ;;  %v1619_v40 = vpop.permute.xlu0 %1618 }
 0x8b1   : > { %v1621_v41 = vmul.f32 %v1619_v40, %v1612_v38 }
 0x8b2   : > { %1642 = vrot.lane.b32.xlu0 %v1632_v39, %s2889_s21  ;;  %s3626_s21 = sld [smem:[#allocation39_spill]] }
 0x8b3   : > { %1638 = vrot.lane.b32.xlu1 %v1621_v41, %s2888_s26  ;;  %v1597_v42 = vpop.permute.xlu1 %1596 }
 0x8b4   : > { %v1599_v45 = vmul.f32 %v1597_v42, %v1591_v43 }
 0x8b8   : > { %v2207_v38 = vld [vmem:[%s3626_s21] ss:$0 sm:$0xff] }
 0x914   : > { %v1635_v44 = vpop.permute.xlu0 %1634 }
 0x915   : > { %v1645_v46 = vsel %vm1014_vm2, %v1599_v45, %v1635_v44 }
 0x924   : > { %v1643_v50 = vpop.permute.xlu0 %1642 }
 0x925   : > { %v1639_v47 = vpop.permute.xlu1 %1638 }
 0x926   : > { %v1647_v51 = vsel %vm1646_vm9, %v1645_v46, %v1639_v47 }
 0x927   : > { %v1649_v59 = vsel %vm1648_vm10, %v1647_v51, %v1643_v50 }
 0x928   : > { %v1650_v52 = vpack.c.bf16 %v1649_v59, %v1649_v59 }
 0x92a   : > { %2340 = vmatmul.mubr.msk.bf16.vlgmr.msra.gmra.mrb[0].mxu1 %vm710_vm0, %v1650_v52 }
 0x92b   : > { %2347 = vmatprep.mubr.msk.bf16.mxu1 %vm2879_vm3, %v2877_v8  ;;  %2344 = vmatpush3.bf16.msra.mxu1 %v2548_v4 }
 0x92c   : > { %2345 = vmatprep.subr.bf16.mxu1 %v2877_v8 }
 0x92f   : > { %2346 = vmatpush3.bf16.msra.mxu1 %v2549_v5 }
 0x9fd   : > { %v1711_v54 = vpop.f32.mrb[0].mxu1 }
 0x9fe   : > { %v1712_v56 = vadd.f32 %v2197_v53, %v1711_v54  ;;  %v2341_v57 = vpop.f32.mrb[1].mxu1 }
 0x9ff   : > { %v1714_v58 = vpop.f32.mrb[2].mxu1 }
 0xa00   : > { %v3457_v60 = vadd.f32 %v1717_v55, %v1712_v56  ;;  %v2342_v61 = vpop.f32.mrb[3].mxu1 }
 0xa02   : > { %v1721_v17 = vsel %vm710_vm0, %v3457_v60, 0.0 }
 0xa03   : > { %1722 = vadd.xlane.f32.xlu1 %v1721_v17 }
 0xa90   : > { %v1723_v62 = vpop.xlane.xlu1 %1722 }
 0xa91   : > { %v1725_v63 = vmul.f32 0.03125, %v1723_v62 }
 0xa93   : > { %v1726_v1 = vsub.f32 %v3457_v60, %v1725_v63 }
 0xa95   : > { %v1727_v2 = vmul.f32 %v1726_v1, %v1726_v1 }
 0xa97   : > { %v1728_v3 = vsel %vm710_vm0, %v1727_v2, 0.0 }
 0xa98   : > { %1729 = vadd.xlane.f32.xlu0 %v1728_v3 }
 0xb25   : > { %v1730_v7 = vpop.xlane.xlu0 %1729 }
 0xb26   : > { %v1731_v9 = vmul.f32 0.03125, %v1730_v7 }
 0xb28   : > { %v1732_v0 = vadd.f32 1e-05, %v1731_v9 }
 0xb2a   : > { %2566 = vrsqrt.f32 %v1732_v0 }
 0xb34   : > { %v2567_v10 = vpop.eup %2566 }
 0xb35   : > { %v1734_v12 = vmul.f32 %v2567_v10, %v1726_v1 }
 0xb37   : > { %v1741_v14 = vmul.f32 %v2201_v11, %v1734_v12 }
 0xb39   : > { %v1748_v15 = vadd.f32 %v2202_v13, %v1741_v14 }
 0xb3b   : > { %v1749_v16 = vpack.c.bf16 %v1748_v15, %v1748_v15 }
 0xb3d   : > { %2348 = vmatmul.mubr.msk.bf16.vlgmr.msra.gmra.mrb[4].mxu1 %vm710_vm0, %v1749_v16 }
 0xc10   : > { %v1810_v27 = vpop.f32.mrb[4].mxu1 }
 0xc11   : > { %v1811_v28 = vadd.f32 %v2203_v26, %v1810_v27  ;;  %v2349_v29 = vpop.f32.mrb[5].mxu1 }
 0xc12   : > { %v1813_v48 = vpop.f32.mrb[6].mxu1 }
 0xc13   : > { %v1817_v49 = vmul.f32 %v1811_v28, %v1811_v28  ;;  %v2350_v30 = vpop.f32.mrb[7].mxu1  ;;  %v1816_v8 = vmul.f32 0.5, %v1811_v28 }
 0xc15   : > { %v1818_v31 = vmul.f32 %v1817_v49, %v1811_v28 }
 0xc17   : > { %v1819_v22 = vmul.f32 0.044715, %v1818_v31 }
 0xc19   : > { %v1820_v32 = vadd.f32 %v1819_v22, %v1811_v28 }
 0xc1b   : > { %v1821_v33 = vmul.f32 0.7978845, %v1820_v32 }
 0xc1d   : > { %2568 = vtanh.f32 %v1821_v33 }
 0xc27   : > { %v2569_v34 = vpop.eup %2568 }
 0xc28   : > { %v1823_v35 = vadd.f32 1.0, %v2569_v34 }
 0xc2a   : > { %v1824_v36 = vmul.f32 %v1823_v35, %v1816_v8 }
 0xc2c   : > { %v1825_v37 = vpack.c.bf16 %v1824_v36, %v1824_v36 }
 0xc2e   : > { %2368 = vmatmul.mubr.bf16.vlgmr.msra.gmra.mrb[0].mxu0 %v1825_v37 }
 0xd01   : > { %v1931_v39 = vpop.f32.mrb[0].mxu0 }
 0xd02   : > { %v1932_v40 = vadd.f32 %v2207_v38, %v1931_v39  ;;  %v2369_v41 = vpop.f32.mrb[1].mxu0 }
 0xd03   : > { %v1934_v42 = vpop.f32.mrb[2].mxu0 }
 0xd04   : > { %v1937_v43 = vadd.f32 %v1932_v40, %v3457_v60  ;;  %v2370_v44 = vpop.f32.mrb[3].mxu0 }
 0xd06   : > { %1938 = vst.msk [vmem:[%s689_s22] sm:$0xff] %vm710_vm0, %v1937_v43 }
 0xd07   : > { %2779 = shalt.err (!%p2776_p7)
}
 0xd08   : > { %s2780_s27 = scalar_lea.hbm %s3515_s2, 128  ;;  %s2784_s26 = scalar_lea.hbm %s3628_s20, 256 }
 0xd09   : > { %p2781_p9 = scmp.ne.s32.totalorder %s3515_s2, %s2780_s27  ;;  %p2785_p1 = scmp.lt.u32.totalorder %s3515_s2, %s3628_s20 }
 0xd0a   : > { %p2786_p13 = scmp.lt.u32.totalorder %s2784_s26, %s2780_s27  ;;  %p2788_p4 = scmp.lt.u32.totalorder %s2780_s27, %s3515_s2 }
 0xd0b   : > { %p2782_p12 = pnand %p2781_p9, %p3629_p8 }
 0xd0c   : > { %p2787_p2 = por %p2786_p13, %p2785_p1 }
 0xd0d   : > { %p2783_p0 = pneg %p2782_p12 }
 0xd0e   : > { %p2789_p10 = por %p2788_p4, %p2787_p2 }
 0xd10   : > { %p2790_p11 = pnand %p2789_p10, %p2783_p0 }
 0xd12   : > { %2793 = shalt.err (!%p2790_p11)
}
 0xd13   : > { %2399 = dma.vmem_to_hbm [thread:$0]  (%p3629_p8), %s3517_s25, 128, %s3515_s2, %s1940_s30  }
 0xd14 PF: > { %s3630_s24 = sld [smem:[#allocation30_spill]]  ;;  %s3631_s19 = sld [smem:[#allocation27_spill]] }
 0xd15   : > { %s3632_s29 = sld [smem:[#allocation33_spill]] }
 0xd1a   : > { %p2441_p3 = scmp.ge.s32.totalorder %s3630_s24, 2  ;;  %s1966_s23 = sand.u32 1, %s3631_s19  }
 0xd1b   : > { %p3633_p5 = scmp.ne.s32.totalorder %s3632_s29, 0  ;;  %s1967_s15 = scalar_lea.sflag [#allocation11], %s1966_s23 }
 0xd1d   : > { %p2424_p6 = pnand %p2441_p3, %p3633_p5 }
 0xd1f   : > { %2839 = dma.done.wait (!%p2424_p6), %s1967_s15, 128  }
 0xd20   : > { %2841 = vsyncadd (!%p2424_p6), %s1967_s15, 4294967168  ;;  %s35_s19 = sadd.s32 1, %s3630_s24   ;;  %s3634_s17 = sld [smem:[#allocation28_spill]] }
 0xd21   : > { %p32_p7 = scmp.ge.s32.totalorder %s35_s19, 4   ;;  %s3635_s29 = sld [smem:[#allocation34_spill]] }
 0xd22   : > { %s3636_s30 = sld [smem:[#allocation29_spill]]  ;;  %s3637_s0 = sld [smem:[#allocation31_spill]] }
 0xd23   : > { %s3638_s27 = smov %s2848_s28  ;;  %34 = sbr.rel (!%p32_p7) target bundleno = 15 (0xf), region = 214 }
 0xd26   : > { %s3639_s28 = smov %s3634_s17 }
 0xd2a   :  { %1972 = vsyncpa [#allocation10], 1 }
 0xd2b   :  { %1974 = vsyncpa [#allocation10 + $0x1], 1 }
 0xd2c   :  { %1975 = vsyncpa [#allocation13], 1 }
 0xd2d   :  { %1976 = vsyncpa [#allocation16], 1 }
 0xd2e   :  { %1977 = vsyncpa [#allocation19], 1 }
 0xd2f   :  { %1978 = vsyncpa [#allocation11], 1 }
 0xd30   :  { %1980 = vsyncpa [#allocation11 + $0x1], 1 }

</bundles_post_ra>
